<compile_context>
chip_gen: v7x
topology: tpu7x:2x2x1
jax: 0.10.0
libtpu: 0.0.40
codegen_flags: <defaults>
</compile_context>

<pallas_src>
import functools

import jax
import jax.numpy as jnp
from jax import lax
from jax.experimental import pallas as pl
from jax.experimental.pallas import tpu as pltpu


def _resblock_kernel(x_ref, w1_ref, w2_ref, o_ref, xpad_ref, *, matmul_dtype):
    """One batch image per grid step.

    x_ref    : (1, H, W, C)        input block (also the residual path)
    w1_ref   : (9, C, Cmid_p)      3x3 conv weights, one (C, Cmid_p) slab per tap
    w2_ref   : (Cmid_p, C)         1x1 conv weights (zero-padded rows)
    o_ref    : (1, H, W, C)
    xpad_ref : (H+2, W+2, C) VMEM  relu(x) with a zero halo
    """
    H = x_ref.shape[1]
    W = x_ref.shape[2]
    C = x_ref.shape[3]

    x = x_ref[0]                                   # (H, W, C) — single HBM-tile read

    # relu(x) into the padded scratch.  Only the 1-wide halo needs explicit
    # zeroing; the interior is fully overwritten every grid step, and the halo
    # is re-zeroed each step so it stays correct under megacore grid sharding.
    zdt = xpad_ref.dtype
    xpad_ref[0:1, :, :] = jnp.zeros((1, W + 2, C), zdt)
    xpad_ref[H + 1:H + 2, :, :] = jnp.zeros((1, W + 2, C), zdt)
    xpad_ref[1:H + 1, 0:1, :] = jnp.zeros((H, 1, C), zdt)
    xpad_ref[1:H + 1, W + 1:W + 2, :] = jnp.zeros((H, 1, C), zdt)
    xpad_ref[1:H + 1, 1:W + 1, :] = jnp.maximum(x, 0.0).astype(zdt)

    # conv3x3 (padding=1) as 9 statically-unrolled MXU matmuls accumulated in
    # f32.  Each tap's LHS is a shifted (H, W, C) window loaded directly from
    # the padded scratch (no im2col copy, no lane-axis concatenates).
    # W % 8 == 0 keeps the (H, W, C) -> (H*W, C) reshape layout-preserving.
    acc = None
    for kh in range(3):
        for kw in range(3):
            lhs = xpad_ref[kh:kh + H, kw:kw + W, :].reshape(H * W, C)
            part = jnp.dot(lhs, w1_ref[kh * 3 + kw],
                           preferred_element_type=jnp.float32)
            acc = part if acc is None else acc + part

    # relu -> conv1x1: (H*W, Cmid_p) @ (Cmid_p, C), f32 accumulate.  Cmid_p is
    # a multiple of 128 (lane-dense); padded rows of w2 are exact zeros.
    h = jnp.maximum(acc, 0.0).astype(matmul_dtype)
    y = jnp.dot(h, w2_ref[...], preferred_element_type=jnp.float32)

    # Residual add in f32, single store of the output block.
    o_ref[0] = (x.astype(jnp.float32) + y.reshape(H, W, C)).astype(o_ref.dtype)


def _round_up(v, m):
    return (v + m - 1) // m * m


def residual_block_nhwc(x_nhwc, w1_hwio, w2_io, matmul_dtype=jnp.float32):
    """x_nhwc: (N, H, W, C).  w1_hwio: (3, 3, C, Cmid).  w2_io: (Cmid, C)."""
    N, H, W, C = x_nhwc.shape
    Cmid = w2_io.shape[0]
    Cmid_p = _round_up(Cmid, 128)   # lane-dense intermediate / contraction

    # (3,3,C,Cmid) -> (9, C, Cmid_p): one weight slab per tap, in (kh, kw)
    # order matching the kernel's unrolled loop; padded columns/rows are exact
    # zeros (no-op math).
    w1_taps = w1_hwio.reshape(9, C, Cmid).astype(matmul_dtype)
    w1_p = jnp.zeros((9, C, Cmid_p), matmul_dtype).at[:, :, :Cmid].set(w1_taps)
    w2_p = jnp.zeros((Cmid_p, C), matmul_dtype).at[:Cmid, :].set(
        w2_io.astype(matmul_dtype))

    x_itemsize = jnp.dtype(x_nhwc.dtype).itemsize
    w_itemsize = jnp.dtype(matmul_dtype).itemsize
    cost = pl.CostEstimate(
        flops=2 * N * H * W * (9 * C * Cmid_p + Cmid_p * C),
        transcendentals=0,
        bytes_accessed=(2 * N * H * W * C * x_itemsize
                        + (w1_p.size + w2_p.size) * w_itemsize),
    )

    # TODO(synk): for large H*W*C (e.g. 56x56x256) add a row-tiled grid axis
    # with a +-1 halo so the per-step working set fits v7x's 64 MiB VMEM.
    return pl.pallas_call(
        functools.partial(_resblock_kernel, matmul_dtype=matmul_dtype),
        out_shape=jax.ShapeDtypeStruct((N, H, W, C), x_nhwc.dtype),
        grid_spec=pltpu.PrefetchScalarGridSpec(
            num_scalar_prefetch=0,
            grid=(N,),
            in_specs=[
                pl.BlockSpec((1, H, W, C), lambda n: (n, 0, 0, 0)),
                pl.BlockSpec((9, C, Cmid_p), lambda n: (0, 0, 0)),
                pl.BlockSpec((Cmid_p, C), lambda n: (0, 0)),
            ],
            out_specs=pl.BlockSpec((1, H, W, C), lambda n: (n, 0, 0, 0)),
            scratch_shapes=[pltpu.VMEM((H + 2, W + 2, C), matmul_dtype)],
        ),
        compiler_params=pltpu.CompilerParams(
            dimension_semantics=("parallel",),
            vmem_limit_bytes=32 * 1024 * 1024,  # safe on v5e/v6e/v7x
        ),
        cost_estimate=cost,
    )(x_nhwc, w1_p, w2_p)


@functools.partial(jax.jit, static_argnames=("matmul_dtype",))
def residual_block_nchw(x_nchw, w1_oihw, w2_oihw, matmul_dtype=jnp.float32):
    """PyTorch-layout entry point.

    x_nchw  : (N, C, H, W)
    w1_oihw : (Cmid, C, 3, 3)   = nn.Conv2d(C, C//4, 3, padding=1, bias=False).weight
    w2_oihw : (C, Cmid, 1, 1)   = nn.Conv2d(C//4, C, 1, bias=False).weight
    """
    x = jnp.transpose(x_nchw, (0, 2, 3, 1))              # NCHW -> NHWC (glue)
    w1_hwio = jnp.transpose(w1_oihw, (2, 3, 1, 0))       # (3, 3, C, Cmid)
    w2_io = jnp.transpose(w2_oihw[:, :, 0, 0], (1, 0))   # (Cmid, C)
    out = residual_block_nhwc(x, w1_hwio, w2_io, matmul_dtype=matmul_dtype)
    return jnp.transpose(out, (0, 3, 1, 2))              # NHWC -> NCHW (glue)


def _reference_nchw(x_nchw, w1_oihw, w2_oihw):
    """Pure-JAX reference in the exact PyTorch layouts (correctness check)."""
    h = jnp.maximum(x_nchw, 0.0)
    h = lax.conv_general_dilated(
        h, w1_oihw, window_strides=(1, 1), padding=((1, 1), (1, 1)),
        dimension_numbers=("NCHW", "OIHW", "NCHW"))
    h = jnp.maximum(h, 0.0)
    h = lax.conv_general_dilated(
        h, w2_oihw, window_strides=(1, 1), padding="VALID",
        dimension_numbers=("NCHW", "OIHW", "NCHW"))
    return x_nchw + h


if __name__ == "__main__":
    # num_channels must be divisible by 4 (Conv2d(C, C//4)); W a multiple of 8
    # keeps the in-kernel (H, W, C) -> (H*W, C) reshape layout-preserving.
    N, C, H, W = 2, 32, 16, 16
    Cmid = C // 4

    key = jax.random.PRNGKey(0)
    kx, k1, k2 = jax.random.split(key, 3)

    x = jax.random.normal(kx, (N, C, H, W), dtype=jnp.float32)
    # Deterministic synthetic weights in the PyTorch layouts:
    #   nn.Conv2d(C, C//4, 3, padding=1, bias=False).weight -> (Cmid, C, 3, 3)
    #   nn.Conv2d(C//4, C, 1, bias=False).weight            -> (C, Cmid, 1, 1)
    w1 = jax.random.normal(k1, (Cmid, C, 3, 3), dtype=jnp.float32) * 0.1
    w2 = jax.random.normal(k2, (C, Cmid, 1, 1), dtype=jnp.float32) * 0.1

    out = residual_block_nchw(x, w1, w2)
    jax.block_until_ready(out)

    ref = _reference_nchw(x, w1, w2)
    assert out.shape == (N, C, H, W)
    assert jnp.allclose(out, ref, atol=1e-4, rtol=1e-4), "mismatch vs reference"

    print("KERNEL_OK")
</pallas_src>

<mosaic_0001>
module attributes {stable_mosaic.version = 11 : i64} {
  func.func @_resblock_kernel(%arg0: i32, %arg1: memref<1x16x16x32xf32, #tpu.memory_space<vmem>>, %arg2: memref<9x32x128xf32, #tpu.memory_space<vmem>>, %arg3: memref<128x32xf32, #tpu.memory_space<vmem>>, %arg4: memref<1x16x16x32xf32, #tpu.memory_space<vmem>>, %arg5: memref<18x18x32xf32, #tpu.memory_space<vmem>>) attributes {dimension_semantics = [#tpu.dimension_semantics<parallel>], iteration_bounds = array<i64: 2>, scalar_prefetch = 0 : i64, scratch_operands = 1 : i64, tpu.core_type = #tpu.core_type<tc>, window_params = [{transform_indices = @transform_0, window_bounds = array<i64: 1, 16, 16, 32>}, {pipeline_mode = #tpu.pipeline_mode<synchronous>, transform_indices = @transform_1, window_bounds = array<i64: 9, 32, 128>}, {pipeline_mode = #tpu.pipeline_mode<synchronous>, transform_indices = @transform_2, window_bounds = array<i64: 128, 32>}, {transform_indices = @transform_3, window_bounds = array<i64: 1, 16, 16, 32>}]} {
    %c0 = arith.constant 0 : index
    %c0_0 = arith.constant 0 : index
    %c0_1 = arith.constant 0 : index
    %c0_2 = arith.constant 0 : index
    %0 = vector.load %arg1[%c0, %c0_0, %c0_1, %c0_2] : memref<1x16x16x32xf32, #tpu.memory_space<vmem>>, vector<1x16x16x32xf32>
    %1 = vector.shape_cast %0 : vector<1x16x16x32xf32> to vector<16x16x32xf32>
    %cst = arith.constant 0.000000e+00 : f32
    %2 = vector.broadcast %cst : f32 to vector<1x18x32xf32>
    %c0_3 = arith.constant 0 : index
    %c0_4 = arith.constant 0 : index
    %c0_5 = arith.constant 0 : index
    %3 = vector.load %arg5[%c0_3, %c0_4, %c0_5] : memref<18x18x32xf32, #tpu.memory_space<vmem>>, vector<1x18x32xf32>
    tpu.vector_store %arg5[%c0_3, %c0_4, %c0_5], %2 {strides = array<i32>} : memref<18x18x32xf32, #tpu.memory_space<vmem>>, vector<1x18x32xf32>,
    %cst_6 = arith.constant 0.000000e+00 : f32
    %4 = vector.broadcast %cst_6 : f32 to vector<1x18x32xf32>
    %c17 = arith.constant 17 : index
    %c0_7 = arith.constant 0 : index
    %c0_8 = arith.constant 0 : index
    %5 = vector.load %arg5[%c17, %c0_7, %c0_8] : memref<18x18x32xf32, #tpu.memory_space<vmem>>, vector<1x18x32xf32>
    tpu.vector_store %arg5[%c17, %c0_7, %c0_8], %4 {strides = array<i32>} : memref<18x18x32xf32, #tpu.memory_space<vmem>>, vector<1x18x32xf32>,
    %cst_9 = arith.constant 0.000000e+00 : f32
    %6 = vector.broadcast %cst_9 : f32 to vector<16x1x32xf32>
    %c1 = arith.constant 1 : index
    %c0_10 = arith.constant 0 : index
    %c0_11 = arith.constant 0 : index
    %7 = vector.load %arg5[%c1, %c0_10, %c0_11] : memref<18x18x32xf32, #tpu.memory_space<vmem>>, vector<16x1x32xf32>
    tpu.vector_store %arg5[%c1, %c0_10, %c0_11], %6 {strides = array<i32>} : memref<18x18x32xf32, #tpu.memory_space<vmem>>, vector<16x1x32xf32>,
    %cst_12 = arith.constant 0.000000e+00 : f32
    %8 = vector.broadcast %cst_12 : f32 to vector<16x1x32xf32>
    %c1_13 = arith.constant 1 : index
    %c17_14 = arith.constant 17 : index
    %c0_15 = arith.constant 0 : index
    %9 = vector.load %arg5[%c1_13, %c17_14, %c0_15] : memref<18x18x32xf32, #tpu.memory_space<vmem>>, vector<16x1x32xf32>
    tpu.vector_store %arg5[%c1_13, %c17_14, %c0_15], %8 {strides = array<i32>} : memref<18x18x32xf32, #tpu.memory_space<vmem>>, vector<16x1x32xf32>,
    %cst_16 = arith.constant 0.000000e+00 : f32
    %10 = vector.broadcast %cst_16 : f32 to vector<16x16x32xf32>
    %11 = arith.maximumf %1, %10 : vector<16x16x32xf32>
    %c1_17 = arith.constant 1 : index
    %c1_18 = arith.constant 1 : index
    %c0_19 = arith.constant 0 : index
    %12 = vector.load %arg5[%c1_17, %c1_18, %c0_19] : memref<18x18x32xf32, #tpu.memory_space<vmem>>, vector<16x16x32xf32>
    tpu.vector_store %arg5[%c1_17, %c1_18, %c0_19], %11 {strides = array<i32>} : memref<18x18x32xf32, #tpu.memory_space<vmem>>, vector<16x16x32xf32>,
    %c0_20 = arith.constant 0 : index
    %c0_21 = arith.constant 0 : index
    %c0_22 = arith.constant 0 : index
    %13 = vector.load %arg5[%c0_20, %c0_21, %c0_22] : memref<18x18x32xf32, #tpu.memory_space<vmem>>, vector<16x16x32xf32>
    %14 = vector.shape_cast %13 : vector<16x16x32xf32> to vector<256x32xf32>
    %c0_23 = arith.constant 0 : index
    %c0_24 = arith.constant 0 : index
    %c0_25 = arith.constant 0 : index
    %15 = vector.load %arg2[%c0_23, %c0_24, %c0_25] : memref<9x32x128xf32, #tpu.memory_space<vmem>>, vector<1x32x128xf32>
    %16 = vector.shape_cast %15 : vector<1x32x128xf32> to vector<32x128xf32>
    %cst_26 = arith.constant dense<0.000000e+00> : vector<256x128xf32>
    %17 = tpu.matmul %14, %16, %cst_26 {dimension_numbers = #tpu.dot_dimension_numbers<[1], [0], [0], [1], [0, 0, 1, 1], [], []>} : vector<256x32xf32>, vector<32x128xf32>, vector<256x128xf32> -> vector<256x128xf32>
    %c0_27 = arith.constant 0 : index
    %c1_28 = arith.constant 1 : index
    %c0_29 = arith.constant 0 : index
    %18 = vector.load %arg5[%c0_27, %c1_28, %c0_29] : memref<18x18x32xf32, #tpu.memory_space<vmem>>, vector<16x16x32xf32>
    %19 = vector.shape_cast %18 : vector<16x16x32xf32> to vector<256x32xf32>
    %c1_30 = arith.constant 1 : index
    %c0_31 = arith.constant 0 : index
    %c0_32 = arith.constant 0 : index
    %20 = vector.load %arg2[%c1_30, %c0_31, %c0_32] : memref<9x32x128xf32, #tpu.memory_space<vmem>>, vector<1x32x128xf32>
    %21 = vector.shape_cast %20 : vector<1x32x128xf32> to vector<32x128xf32>
    %cst_33 = arith.constant dense<0.000000e+00> : vector<256x128xf32>
    %22 = tpu.matmul %19, %21, %cst_33 {dimension_numbers = #tpu.dot_dimension_numbers<[1], [0], [0], [1], [0, 0, 1, 1], [], []>} : vector<256x32xf32>, vector<32x128xf32>, vector<256x128xf32> -> vector<256x128xf32>
    %23 = arith.addf %17, %22 : vector<256x128xf32>
    %c0_34 = arith.constant 0 : index
    %c2 = arith.constant 2 : index
    %c0_35 = arith.constant 0 : index
    %24 = vector.load %arg5[%c0_34, %c2, %c0_35] : memref<18x18x32xf32, #tpu.memory_space<vmem>>, vector<16x16x32xf32>
    %25 = vector.shape_cast %24 : vector<16x16x32xf32> to vector<256x32xf32>
    %c2_36 = arith.constant 2 : index
    %c0_37 = arith.constant 0 : index
    %c0_38 = arith.constant 0 : index
    %26 = vector.load %arg2[%c2_36, %c0_37, %c0_38] : memref<9x32x128xf32, #tpu.memory_space<vmem>>, vector<1x32x128xf32>
    %27 = vector.shape_cast %26 : vector<1x32x128xf32> to vector<32x128xf32>
    %cst_39 = arith.constant dense<0.000000e+00> : vector<256x128xf32>
    %28 = tpu.matmul %25, %27, %cst_39 {dimension_numbers = #tpu.dot_dimension_numbers<[1], [0], [0], [1], [0, 0, 1, 1], [], []>} : vector<256x32xf32>, vector<32x128xf32>, vector<256x128xf32> -> vector<256x128xf32>
    %29 = arith.addf %23, %28 : vector<256x128xf32>
    %c1_40 = arith.constant 1 : index
    %c0_41 = arith.constant 0 : index
    %c0_42 = arith.constant 0 : index
    %30 = vector.load %arg5[%c1_40, %c0_41, %c0_42] : memref<18x18x32xf32, #tpu.memory_space<vmem>>, vector<16x16x32xf32>
    %31 = vector.shape_cast %30 : vector<16x16x32xf32> to vector<256x32xf32>
    %c3 = arith.constant 3 : index
    %c0_43 = arith.constant 0 : index
    %c0_44 = arith.constant 0 : index
    %32 = vector.load %arg2[%c3, %c0_43, %c0_44] : memref<9x32x128xf32, #tpu.memory_space<vmem>>, vector<1x32x128xf32>
    %33 = vector.shape_cast %32 : vector<1x32x128xf32> to vector<32x128xf32>
    %cst_45 = arith.constant dense<0.000000e+00> : vector<256x128xf32>
    %34 = tpu.matmul %31, %33, %cst_45 {dimension_numbers = #tpu.dot_dimension_numbers<[1], [0], [0], [1], [0, 0, 1, 1], [], []>} : vector<256x32xf32>, vector<32x128xf32>, vector<256x128xf32> -> vector<256x128xf32>
    %35 = arith.addf %29, %34 : vector<256x128xf32>
    %c1_46 = arith.constant 1 : index
    %c1_47 = arith.constant 1 : index
    %c0_48 = arith.constant 0 : index
    %36 = vector.load %arg5[%c1_46, %c1_47, %c0_48] : memref<18x18x32xf32, #tpu.memory_space<vmem>>, vector<16x16x32xf32>
    %37 = vector.shape_cast %36 : vector<16x16x32xf32> to vector<256x32xf32>
    %c4 = arith.constant 4 : index
    %c0_49 = arith.constant 0 : index
    %c0_50 = arith.constant 0 : index
    %38 = vector.load %arg2[%c4, %c0_49, %c0_50] : memref<9x32x128xf32, #tpu.memory_space<vmem>>, vector<1x32x128xf32>
    %39 = vector.shape_cast %38 : vector<1x32x128xf32> to vector<32x128xf32>
    %cst_51 = arith.constant dense<0.000000e+00> : vector<256x128xf32>
    %40 = tpu.matmul %37, %39, %cst_51 {dimension_numbers = #tpu.dot_dimension_numbers<[1], [0], [0], [1], [0, 0, 1, 1], [], []>} : vector<256x32xf32>, vector<32x128xf32>, vector<256x128xf32> -> vector<256x128xf32>
    %41 = arith.addf %35, %40 : vector<256x128xf32>
    %c1_52 = arith.constant 1 : index
    %c2_53 = arith.constant 2 : index
    %c0_54 = arith.constant 0 : index
    %42 = vector.load %arg5[%c1_52, %c2_53, %c0_54] : memref<18x18x32xf32, #tpu.memory_space<vmem>>, vector<16x16x32xf32>
    %43 = vector.shape_cast %42 : vector<16x16x32xf32> to vector<256x32xf32>
    %c5 = arith.constant 5 : index
    %c0_55 = arith.constant 0 : index
    %c0_56 = arith.constant 0 : index
    %44 = vector.load %arg2[%c5, %c0_55, %c0_56] : memref<9x32x128xf32, #tpu.memory_space<vmem>>, vector<1x32x128xf32>
    %45 = vector.shape_cast %44 : vector<1x32x128xf32> to vector<32x128xf32>
    %cst_57 = arith.constant dense<0.000000e+00> : vector<256x128xf32>
    %46 = tpu.matmul %43, %45, %cst_57 {dimension_numbers = #tpu.dot_dimension_numbers<[1], [0], [0], [1], [0, 0, 1, 1], [], []>} : vector<256x32xf32>, vector<32x128xf32>, vector<256x128xf32> -> vector<256x128xf32>
    %47 = arith.addf %41, %46 : vector<256x128xf32>
    %c2_58 = arith.constant 2 : index
    %c0_59 = arith.constant 0 : index
    %c0_60 = arith.constant 0 : index
    %48 = vector.load %arg5[%c2_58, %c0_59, %c0_60] : memref<18x18x32xf32, #tpu.memory_space<vmem>>, vector<16x16x32xf32>
    %49 = vector.shape_cast %48 : vector<16x16x32xf32> to vector<256x32xf32>
    %c6 = arith.constant 6 : index
    %c0_61 = arith.constant 0 : index
    %c0_62 = arith.constant 0 : index
    %50 = vector.load %arg2[%c6, %c0_61, %c0_62] : memref<9x32x128xf32, #tpu.memory_space<vmem>>, vector<1x32x128xf32>
    %51 = vector.shape_cast %50 : vector<1x32x128xf32> to vector<32x128xf32>
    %cst_63 = arith.constant dense<0.000000e+00> : vector<256x128xf32>
    %52 = tpu.matmul %49, %51, %cst_63 {dimension_numbers = #tpu.dot_dimension_numbers<[1], [0], [0], [1], [0, 0, 1, 1], [], []>} : vector<256x32xf32>, vector<32x128xf32>, vector<256x128xf32> -> vector<256x128xf32>
    %53 = arith.addf %47, %52 : vector<256x128xf32>
    %c2_64 = arith.constant 2 : index
    %c1_65 = arith.constant 1 : index
    %c0_66 = arith.constant 0 : index
    %54 = vector.load %arg5[%c2_64, %c1_65, %c0_66] : memref<18x18x32xf32, #tpu.memory_space<vmem>>, vector<16x16x32xf32>
    %55 = vector.shape_cast %54 : vector<16x16x32xf32> to vector<256x32xf32>
    %c7 = arith.constant 7 : index
    %c0_67 = arith.constant 0 : index
    %c0_68 = arith.constant 0 : index
    %56 = vector.load %arg2[%c7, %c0_67, %c0_68] : memref<9x32x128xf32, #tpu.memory_space<vmem>>, vector<1x32x128xf32>
    %57 = vector.shape_cast %56 : vector<1x32x128xf32> to vector<32x128xf32>
    %cst_69 = arith.constant dense<0.000000e+00> : vector<256x128xf32>
    %58 = tpu.matmul %55, %57, %cst_69 {dimension_numbers = #tpu.dot_dimension_numbers<[1], [0], [0], [1], [0, 0, 1, 1], [], []>} : vector<256x32xf32>, vector<32x128xf32>, vector<256x128xf32> -> vector<256x128xf32>
    %59 = arith.addf %53, %58 : vector<256x128xf32>
    %c2_70 = arith.constant 2 : index
    %c2_71 = arith.constant 2 : index
    %c0_72 = arith.constant 0 : index
    %60 = vector.load %arg5[%c2_70, %c2_71, %c0_72] : memref<18x18x32xf32, #tpu.memory_space<vmem>>, vector<16x16x32xf32>
    %61 = vector.shape_cast %60 : vector<16x16x32xf32> to vector<256x32xf32>
    %c8 = arith.constant 8 : index
    %c0_73 = arith.constant 0 : index
    %c0_74 = arith.constant 0 : index
    %62 = vector.load %arg2[%c8, %c0_73, %c0_74] : memref<9x32x128xf32, #tpu.memory_space<vmem>>, vector<1x32x128xf32>
    %63 = vector.shape_cast %62 : vector<1x32x128xf32> to vector<32x128xf32>
    %cst_75 = arith.constant dense<0.000000e+00> : vector<256x128xf32>
    %64 = tpu.matmul %61, %63, %cst_75 {dimension_numbers = #tpu.dot_dimension_numbers<[1], [0], [0], [1], [0, 0, 1, 1], [], []>} : vector<256x32xf32>, vector<32x128xf32>, vector<256x128xf32> -> vector<256x128xf32>
    %65 = arith.addf %59, %64 : vector<256x128xf32>
    %cst_76 = arith.constant 0.000000e+00 : f32
    %66 = vector.broadcast %cst_76 : f32 to vector<256x128xf32>
    %67 = arith.maximumf %65, %66 : vector<256x128xf32>
    %c0_77 = arith.constant 0 : index
    %c0_78 = arith.constant 0 : index
    %68 = vector.load %arg3[%c0_77, %c0_78] : memref<128x32xf32, #tpu.memory_space<vmem>>, vector<128x32xf32>
    %cst_79 = arith.constant dense<0.000000e+00> : vector<256x32xf32>
    %69 = tpu.matmul %67, %68, %cst_79 {dimension_numbers = #tpu.dot_dimension_numbers<[1], [0], [0], [1], [0, 0, 1, 1], [], []>} : vector<256x128xf32>, vector<128x32xf32>, vector<256x32xf32> -> vector<256x32xf32>
    %70 = vector.shape_cast %69 : vector<256x32xf32> to vector<16x16x32xf32>
    %71 = arith.addf %1, %70 : vector<16x16x32xf32>
    %c0_80 = arith.constant 0 : index
    %c0_81 = arith.constant 0 : index
    %c0_82 = arith.constant 0 : index
    %c0_83 = arith.constant 0 : index
    %72 = vector.load %arg4[%c0_80, %c0_81, %c0_82, %c0_83] : memref<1x16x16x32xf32, #tpu.memory_space<vmem>>, vector<1x16x16x32xf32>
    %73 = vector.shape_cast %72 : vector<1x16x16x32xf32> to vector<16x16x32xf32>
    %74 = vector.shape_cast %71 : vector<16x16x32xf32> to vector<1x16x16x32xf32>
    tpu.vector_store %arg4[%c0_80, %c0_81, %c0_82, %c0_83], %74 {strides = array<i32>} : memref<1x16x16x32xf32, #tpu.memory_space<vmem>>, vector<1x16x16x32xf32>,
    return
  }
  func.func @transform_0(%arg0: i32) -> (i32, i32, i32, i32) {
    %c0_i32 = arith.constant 0 : i32
    %c0_i32_0 = arith.constant 0 : i32
    %c0_i32_1 = arith.constant 0 : i32
    %c0_i32_2 = arith.constant 0 : i32
    return %arg0, %c0_i32, %c0_i32_0, %c0_i32_1 : i32, i32, i32, i32
  }
  func.func @transform_1(%arg0: i32) -> (i32, i32, i32) {
    %c0_i32 = arith.constant 0 : i32
    %c0_i32_0 = arith.constant 0 : i32
    %c0_i32_1 = arith.constant 0 : i32
    %c0_i32_2 = arith.constant 0 : i32
    return %c0_i32, %c0_i32_0, %c0_i32_1 : i32, i32, i32
  }
  func.func @transform_2(%arg0: i32) -> (i32, i32) {
    %c0_i32 = arith.constant 0 : i32
    %c0_i32_0 = arith.constant 0 : i32
    %c0_i32_1 = arith.constant 0 : i32
    return %c0_i32, %c0_i32_0 : i32, i32
  }
  func.func @transform_3(%arg0: i32) -> (i32, i32, i32, i32) {
    %c0_i32 = arith.constant 0 : i32
    %c0_i32_0 = arith.constant 0 : i32
    %c0_i32_1 = arith.constant 0 : i32
    %c0_i32_2 = arith.constant 0 : i32
    return %arg0, %c0_i32, %c0_i32_0, %c0_i32_1 : i32, i32, i32, i32
  }
}

</mosaic_0001>

<bundles_post_ra>
// kernel: residual_block_nchw.1
= control target key start
LH: loop header
LB: loop body
LE: loop exit
PB: predicated region body
PF: predicated region fallthrough
CT: control target
= control target key end

     0   :  { %8 = vsyncpa [#allocation4], 0  ;;  %s7202_s0 = inlined_call_operand.vmem [shape: f32[2,16,16,32], index: 0, kind: input, shape index: {}]   ;;  %s7203_s1 = inlined_call_operand.vmem [shape: f32[9,32,128], index: 1, kind: input, shape index: {}]   ;;  %s7204_s2 = inlined_call_operand.vmem [shape: f32[128,32], index: 2, kind: input, shape index: {}]   ;;  %s7205_s3 = inlined_call_operand.hbm [shape: f32[2,16,16,32], index: 3, kind: output, shape index: {}]  }
   0x1   :  { %10 = vsyncpa [#allocation4 + $0x1], 0  ;;  %s5979_s12 = smov 0   ;;  %s5981_s13 = smov 0  }
   0x2   :  { %s5983_s14 = smov 0   ;;  %s5985_s15 = smov 0  }
   0x3 LB: > { %s6000_s16 = sadd.s32 4294967295, %s5953_s15   ;;  %s4167_s17 = sadd.s32 4294967294, %s5953_s15   ;;  %s5953_s15 = sphi %s5985_s15, %s7291_s15   ;;  %s5949_s14 = sphi %s5983_s14, %s7290_s14   ;;  %s5945_s13 = sphi %s5981_s13, %s7289_s13   ;;  %s5941_s12 = sphi %s5979_s12, %s7288_s12  }
   0x4   : > { %s6004_s18 = sadd.s32 1, %s5953_s15   ;;  %s91_s19 = sadd.s32 1, %s5949_s14 }
   0x5   : > { %s88_s20 = ssub.s32 %s5953_s15, %s6004_s18  ;;  %p101_p0 = scmp.ne.s32.totalorder %s5949_s14, %s5945_s13 }
   0x6   : > { %p89_p1 = scmp.eq.s32.totalorder %s88_s20, 0  ;;  %p102_p2 = scmp.eq.s32.totalorder %s6000_s16, 1 }
   0x7   : > { %p107_p3 = scmp.ne.s32.totalorder %s5945_s13, %s5941_s12  ;;  %p108_p4 = scmp.eq.s32.totalorder %s4167_s17, 1 }
   0x8   : > { %s6015_s21 = scalar_select %p89_p1, %s5949_s14, %s91_s19  }
   0x9   : > { %p6017_p5 = por %p102_p2, %p101_p0  ;;  %p6021_p6 = por %p108_p4, %p107_p3 }
   0xa   : > { %p4170_p7 = scmp.ge.s32.totalorder %s5953_s15, 1  ;;  %p140_p8 = scmp.lt.s32.totalorder %s5953_s15, 3 }
   0xc   : > { %p141_p9 = pnand %p4170_p7, %p140_p8 }
   0xe   : > { %144 = sbr.rel (%p141_p9) target bundleno = 816 (0x330), region = 32 }
  0x15   : > { %v4174_v0 = vld [vmem:[%s7203_s1 + $0x20] sm:$0xff]  ;;  %v4175_v1 = vld [vmem:[%s7203_s1 + $0x28] sm:$0xff]  ;;  %vm201_vm0 = vcmask 261120   ;;  %vm204_vm1 = vcmask 254976   ;;  %v4176_v5 = vld [vmem:[%s7203_s1 + $0x30] sm:$0xff]  ;;  %v5955_v7 = vmov 0.0  }
  0x16   : > { %v4314_v2 = vld [vmem:[%s7203_s1 + $0x80] sm:$0xff]  ;;  %v5457_v3 = vpack.c.bf16 %v4175_v1, %v4174_v0  ;;  %v4315_v4 = vld [vmem:[%s7203_s1 + $0x88] sm:$0xff]  ;;  %v4177_v6 = vld [vmem:[%s7203_s1 + $0x38] sm:$0xff]  ;;  %202 = vst.msk [vmem:[#allocation2] sm:$0xff] %vm201_vm0, %v5955_v7  ;;  %p164_p10 = scmp.lt.s32.totalorder %s6000_s16, 1  ;;  %vm211_vm2 = vcmask 253952  }
  0x17   : > { %203 = vst.msk [vmem:[#allocation2 + $0x8] sm:$0xff] %vm201_vm0, %v5955_v7  ;;  %207 = vst.msk [vmem:[#allocation2 + $0x198] sm:$0xff] %vm201_vm0, %v5955_v7  ;;  %v5489_v8 = vpack.c.bf16 %v4315_v4, %v4314_v2  ;;  %v5461_v9 = vpack.c.bf16 %v4177_v6, %v4176_v5  ;;  %v4316_v10 = vld [vmem:[%s7203_s1 + $0x90] sm:$0xff]  ;;  %v4317_v11 = vld [vmem:[%s7203_s1 + $0x98] sm:$0xff]  ;;  %s161_s29 = sand.u32 1, %s5945_s13   ;;  %s4500_s5 = sshll.u32 %s6000_s16, 12 }
  0x18   : > { %208 = vst.msk [vmem:[#allocation2 + $0x1a0] sm:$0xff] %vm201_vm0, %v5955_v7  ;;  %5458 = vmatprep.subr.bf16.mxu1 %v5457_v3  ;;  %v5493_v12 = vpack.c.bf16 %v4317_v11, %v4316_v10  ;;  %s165_s19 = scalar_select %p164_p10, %s6000_s16, 1  ;;  %v4350_v13 = vld [vmem:[%s7203_s1 + $0xa0] sm:$0xff]  ;;  %v4351_v14 = vld [vmem:[%s7203_s1 + $0xa8] sm:$0xff]  ;;  %v342_v19 = vld [vmem:[%s7203_s1 + $0x10] sm:$0xff] }
  0x19   : > { %205 = vst.msk [vmem:[#allocation2 + $0x10] sm:$0x3] %vm204_vm1, %v5955_v7  ;;  %209 = vst.msk [vmem:[#allocation2 + $0x1a8] sm:$0x3] %vm204_vm1, %v5955_v7  ;;  %5460 = vmatpush3.bf16.msra.mxu1 %v5457_v3  ;;  %5490 = vmatprep.subr.bf16.mxu0 %v5489_v8  ;;  %v340_v15 = vld [vmem:[%s7203_s1] sm:$0xff]  ;;  %v341_v16 = vld [vmem:[%s7203_s1 + $0x8] sm:$0xff]  ;;  %v6108_v17 = vpack.c.bf16 %v4351_v14, %v4350_v13  ;;  %s7150_s10 = scalar_lea.hbm %s7205_s3, %s4500_s5 }
  0x1a   : > { %212 = vst.msk [vmem:[#allocation2 + $0x18] sm:$0x1] %vm211_vm2, %v5955_v7  ;;  %213 = vst.msk [vmem:[#allocation2 + $0x30] sm:$0x1] %vm211_vm2, %v5955_v7  ;;  %5462 = vmatprep.subr.bf16.mxu1 %v5461_v9  ;;  %5492 = vmatpush3.bf16.msra.mxu0 %v5489_v8  ;;  %s4499_s4 = sshll.u32 %s165_s19, 8  ;;  %v5465_v18 = vpack.c.bf16 %v341_v16, %v340_v15  ;;  %v343_v20 = vld [vmem:[%s7203_s1 + $0x18] sm:$0xff] }
  0x1b   : > { %214 = vst.msk [vmem:[#allocation2 + $0x48] sm:$0x1] %vm211_vm2, %v5955_v7  ;;  %215 = vst.msk [vmem:[#allocation2 + $0x60] sm:$0x1] %vm211_vm2, %v5955_v7  ;;  %5494 = vmatprep.subr.bf16.mxu0 %v5493_v12  ;;  %s6106_s7 = scalar_lea.vmem %s7202_s0, %s4499_s4  ;;  %v6124_v34 = vpack.c.bf16 %v343_v20, %v342_v19  ;;  %v4352_v53 = vld [vmem:[%s7203_s1 + $0xb0] sm:$0xff]  ;;  %v4353_v54 = vld [vmem:[%s7203_s1 + $0xb8] sm:$0xff] }
  0x1c   : > { %216 = vst.msk [vmem:[#allocation2 + $0x78] sm:$0x1] %vm211_vm2, %v5955_v7  ;;  %217 = vst.msk [vmem:[#allocation2 + $0x90] sm:$0x1] %vm211_vm2, %v5955_v7  ;;  %v169_v21 = vld [vmem:[%s6106_s7] sm:$0xff]  ;;  %v170_v22 = vld [vmem:[%s6106_s7 + $0x8] sm:$0xff]  ;;  %v5501_v19 = vpack.c.bf16 %v4353_v54, %v4352_v53 }
  0x1d   : > { %218 = vst.msk [vmem:[#allocation2 + $0xa8] sm:$0x1] %vm211_vm2, %v5955_v7  ;;  %219 = vst.msk [vmem:[#allocation2 + $0xc0] sm:$0x1] %vm211_vm2, %v5955_v7  ;;  %v171_v23 = vld [vmem:[%s6106_s7 + $0x10] sm:$0xff]  ;;  %5464 = vmatpush3.bf16.msra.mxu1 %v5461_v9  ;;  %v244_v26 = vmax.f32 %v169_v21, 0.0 }
  0x1e   : > { %220 = vst.msk [vmem:[#allocation2 + $0xd8] sm:$0x1] %vm211_vm2, %v5955_v7  ;;  %221 = vst.msk [vmem:[#allocation2 + $0xf0] sm:$0x1] %vm211_vm2, %v5955_v7  ;;  %v344_v24 = vld [vmem:[#allocation2 + $0x1] sm:$0xff]  ;;  %v245_v27 = vmax.f32 %v170_v22, 0.0  ;;  %5496 = vmatpush3.bf16.msra.mxu0 %v5493_v12  ;;  %5466 = vmatprep.subr.bf16.mxu1 %v5465_v18 }
  0x1f   : > { %222 = vst.msk [vmem:[#allocation2 + $0x108] sm:$0x1] %vm211_vm2, %v5955_v7  ;;  %223 = vst.msk [vmem:[#allocation2 + $0x120] sm:$0x1] %vm211_vm2, %v5955_v7  ;;  %v246_v28 = vmax.f32 %v171_v23, 0.0  ;;  %v172_v29 = vld [vmem:[%s6106_s7 + $0x18] sm:$0xff]  ;;  %4881 = vmatprep.mubr.msk.f32.mxu1 %vm201_vm0, %v344_v24  ;;  %5498 = vmatprep.subr.bf16.mxu0 %v6108_v17 }
  0x20   : > { %224 = vst.msk [vmem:[#allocation2 + $0x138] sm:$0x1] %vm211_vm2, %v5955_v7  ;;  %225 = vst.msk [vmem:[#allocation2 + $0x150] sm:$0x1] %vm211_vm2, %v5955_v7  ;;  %v345_v25 = vld [vmem:[#allocation2 + $0x9] sm:$0xff]  ;;  %v247_v30 = vmax.f32 %v172_v29, 0.0 }
  0x21   : > { %226 = vst.msk [vmem:[#allocation2 + $0x168] sm:$0x1] %vm211_vm2, %v5955_v7  ;;  %227 = vst.msk [vmem:[#allocation2 + $0x180] sm:$0x1] %vm211_vm2, %v5955_v7  ;;  %v173_v31 = vld [vmem:[%s6106_s7 + $0x20] sm:$0xff]  ;;  %v174_v32 = vld [vmem:[%s6106_s7 + $0x28] sm:$0xff]  ;;  %4882 = vmatmul.mubr.msk.f32.vlgmr.msra.gmra.mrb[0].mxu1 %vm201_vm0, %v345_v25 }
  0x22   : > { %228 = vst.msk [vmem:[#allocation2 + $0x29] sm:$0x1] %vm211_vm2, %v5955_v7  ;;  %229 = vst.msk [vmem:[#allocation2 + $0x41] sm:$0x1] %vm211_vm2, %v5955_v7  ;;  %v175_v33 = vld [vmem:[%s6106_s7 + $0x30] sm:$0xff]  ;;  %v248_v35 = vmax.f32 %v173_v31, 0.0  ;;  %5468 = vmatpush3.bf16.msra.mxu1 %v5465_v18 }
  0x23   : > { %230 = vst.msk [vmem:[#allocation2 + $0x59] sm:$0x1] %vm211_vm2, %v5955_v7  ;;  %231 = vst.msk [vmem:[#allocation2 + $0x71] sm:$0x1] %vm211_vm2, %v5955_v7  ;;  %v249_v36 = vmax.f32 %v174_v32, 0.0  ;;  %v250_v37 = vmax.f32 %v175_v33, 0.0  ;;  %5470 = vmatprep.subr.bf16.mxu1 %v6124_v34 }
  0x24   : > { %232 = vst.msk [vmem:[#allocation2 + $0x89] sm:$0x1] %vm211_vm2, %v5955_v7  ;;  %233 = vst.msk [vmem:[#allocation2 + $0xa1] sm:$0x1] %vm211_vm2, %v5955_v7  ;;  %v176_v38 = vld [vmem:[%s6106_s7 + $0x38] sm:$0xff]  ;;  %v177_v39 = vld [vmem:[%s6106_s7 + $0x40] sm:$0xff] }
  0x25   : > { %234 = vst.msk [vmem:[#allocation2 + $0xb9] sm:$0x1] %vm211_vm2, %v5955_v7  ;;  %235 = vst.msk [vmem:[#allocation2 + $0xd1] sm:$0x1] %vm211_vm2, %v5955_v7  ;;  %v178_v40 = vld [vmem:[%s6106_s7 + $0x48] sm:$0xff]  ;;  %v251_v41 = vmax.f32 %v176_v38, 0.0 }
  0x26   : > { %236 = vst.msk [vmem:[#allocation2 + $0xe9] sm:$0x1] %vm211_vm2, %v5955_v7  ;;  %237 = vst.msk [vmem:[#allocation2 + $0x101] sm:$0x1] %vm211_vm2, %v5955_v7  ;;  %v252_v42 = vmax.f32 %v177_v39, 0.0  ;;  %v253_v43 = vmax.f32 %v178_v40, 0.0  ;;  %5472 = vmatpush3.bf16.msra.mxu1 %v6124_v34 }
  0x27   : > { %238 = vst.msk [vmem:[#allocation2 + $0x119] sm:$0x1] %vm211_vm2, %v5955_v7  ;;  %239 = vst.msk [vmem:[#allocation2 + $0x131] sm:$0x1] %vm211_vm2, %v5955_v7  ;;  %v179_v44 = vld [vmem:[%s6106_s7 + $0x50] sm:$0xff]  ;;  %v180_v45 = vld [vmem:[%s6106_s7 + $0x58] sm:$0xff] }
  0x28   : > { %240 = vst.msk [vmem:[#allocation2 + $0x149] sm:$0x1] %vm211_vm2, %v5955_v7  ;;  %241 = vst.msk [vmem:[#allocation2 + $0x161] sm:$0x1] %vm211_vm2, %v5955_v7  ;;  %v181_v46 = vld [vmem:[%s6106_s7 + $0x60] sm:$0xff]  ;;  %v254_v47 = vmax.f32 %v179_v44, 0.0 }
  0x29   : > { %242 = vst.msk [vmem:[#allocation2 + $0x179] sm:$0x1] %vm211_vm2, %v5955_v7  ;;  %243 = vst.msk [vmem:[#allocation2 + $0x191] sm:$0x1] %vm211_vm2, %v5955_v7  ;;  %v255_v48 = vmax.f32 %v180_v45, 0.0  ;;  %v256_v49 = vmax.f32 %v181_v46, 0.0 }
  0x2a   : > { %276 = vst.msk [vmem:[#allocation2 + $0x19] sm:$0xff] %vm201_vm0, %v244_v26  ;;  %277 = vst.msk [vmem:[#allocation2 + $0x21] sm:$0xff] %vm201_vm0, %v245_v27  ;;  %v182_v50 = vld [vmem:[%s6106_s7 + $0x68] sm:$0xff]  ;;  %v183_v51 = vld [vmem:[%s6106_s7 + $0x70] sm:$0xff]  ;;  %s4171_s30 = sshll.u32 %s161_s29, 8  ;;  %s7161_s16 = scalar_lea.sflag [#allocation4], %s161_s29 }
  0x2b   : > { %278 = vst.msk [vmem:[#allocation2 + $0x31] sm:$0xff] %vm201_vm0, %v246_v28  ;;  %279 = vst.msk [vmem:[#allocation2 + $0x39] sm:$0xff] %vm201_vm0, %v247_v30  ;;  %v184_v52 = vld [vmem:[%s6106_s7 + $0x78] sm:$0xff]  ;;  %v257_v55 = vmax.f32 %v182_v50, 0.0  ;;  %v258_v56 = vmax.f32 %v183_v51, 0.0  ;;  %v185_v58 = vld [vmem:[%s6106_s7 + $0x80] sm:$0xff] }
  0x2c   : > { %280 = vst.msk [vmem:[#allocation2 + $0x49] sm:$0xff] %vm201_vm0, %v248_v35  ;;  %281 = vst.msk [vmem:[#allocation2 + $0x51] sm:$0xff] %vm201_vm0, %v249_v36  ;;  %v259_v57 = vmax.f32 %v184_v52, 0.0  ;;  %v186_v59 = vld [vmem:[%s6106_s7 + $0x88] sm:$0xff]  ;;  %v187_v60 = vld [vmem:[%s6106_s7 + $0x90] sm:$0xff]  ;;  %v260_v61 = vmax.f32 %v185_v58, 0.0 }
  0x2d   : > { %282 = vst.msk [vmem:[#allocation2 + $0x61] sm:$0xff] %vm201_vm0, %v250_v37  ;;  %283 = vst.msk [vmem:[#allocation2 + $0x69] sm:$0xff] %vm201_vm0, %v251_v41  ;;  %v261_v62 = vmax.f32 %v186_v59, 0.0  ;;  %v262_v63 = vmax.f32 %v187_v60, 0.0  ;;  %v188_v0 = vld [vmem:[%s6106_s7 + $0x98] sm:$0xff]  ;;  %v189_v1 = vld [vmem:[%s6106_s7 + $0xa0] sm:$0xff] }
  0x2e   : > { %284 = vst.msk [vmem:[#allocation2 + $0x79] sm:$0xff] %vm201_vm0, %v252_v42  ;;  %285 = vst.msk [vmem:[#allocation2 + $0x81] sm:$0xff] %vm201_vm0, %v253_v43  ;;  %v190_v2 = vld [vmem:[%s6106_s7 + $0xa8] sm:$0xff]  ;;  %v263_v3 = vmax.f32 %v188_v0, 0.0  ;;  %v264_v4 = vmax.f32 %v189_v1, 0.0  ;;  %v191_v6 = vld [vmem:[%s6106_s7 + $0xb0] sm:$0xff] }
  0x2f   : > { %286 = vst.msk [vmem:[#allocation2 + $0x91] sm:$0xff] %vm201_vm0, %v254_v47  ;;  %287 = vst.msk [vmem:[#allocation2 + $0x99] sm:$0xff] %vm201_vm0, %v255_v48  ;;  %v265_v5 = vmax.f32 %v190_v2, 0.0  ;;  %v192_v7 = vld [vmem:[%s6106_s7 + $0xb8] sm:$0xff]  ;;  %v193_v8 = vld [vmem:[%s6106_s7 + $0xc0] sm:$0xff]  ;;  %v266_v9 = vmax.f32 %v191_v6, 0.0 }
  0x30   : > { %288 = vst.msk [vmem:[#allocation2 + $0xa9] sm:$0xff] %vm201_vm0, %v256_v49  ;;  %289 = vst.msk [vmem:[#allocation2 + $0xb1] sm:$0xff] %vm201_vm0, %v257_v55  ;;  %v267_v10 = vmax.f32 %v192_v7, 0.0  ;;  %v268_v11 = vmax.f32 %v193_v8, 0.0  ;;  %v194_v12 = vld [vmem:[%s6106_s7 + $0xc8] sm:$0xff]  ;;  %v195_v13 = vld [vmem:[%s6106_s7 + $0xd0] sm:$0xff] }
  0x31   : > { %290 = vst.msk [vmem:[#allocation2 + $0xc1] sm:$0xff] %vm201_vm0, %v258_v56  ;;  %291 = vst.msk [vmem:[#allocation2 + $0xc9] sm:$0xff] %vm201_vm0, %v259_v57  ;;  %v196_v14 = vld [vmem:[%s6106_s7 + $0xd8] sm:$0xff]  ;;  %v347_v16 = vld [vmem:[#allocation2 + $0x21] sm:$0xff]  ;;  %v269_v20 = vmax.f32 %v194_v12, 0.0  ;;  %v270_v21 = vmax.f32 %v195_v13, 0.0 }
  0x32   : > { %292 = vst.msk [vmem:[#allocation2 + $0xd9] sm:$0xff] %vm201_vm0, %v260_v61  ;;  %293 = vst.msk [vmem:[#allocation2 + $0xe1] sm:$0xff] %vm201_vm0, %v261_v62  ;;  %v346_v15 = vld [vmem:[#allocation2 + $0x19] sm:$0xff]  ;;  %v348_v18 = vld [vmem:[#allocation2 + $0x31] sm:$0xff]  ;;  %v271_v22 = vmax.f32 %v196_v14, 0.0  ;;  %s7054_s4 = scalar_lea.vmem [#allocation3], %s4171_s30 }
  0x33   : > { %294 = vst.msk [vmem:[#allocation2 + $0xf1] sm:$0xff] %vm201_vm0, %v262_v63  ;;  %295 = vst.msk [vmem:[#allocation2 + $0xf9] sm:$0xff] %vm201_vm0, %v263_v3  ;;  %4884 = vmatprep.mubr.msk.f32.mxu1 %vm201_vm0, %v346_v15  ;;  %5105 = vmatprep.mubr.msk.f32.mxu0 %vm201_vm0, %v346_v15  ;;  %v197_v23 = vld [vmem:[%s6106_s7 + $0xe0] sm:$0xff]  ;;  %v198_v24 = vld [vmem:[%s6106_s7 + $0xe8] sm:$0xff]  ;;  %s4105_s6 = sshll.u32 %s7054_s4, 4  ;;  %s5956_s17 = smov [#allocation3]   ;;  %s7152_s6 = int_to_ptr.vmem [resolvable:$true] %s4105_s6 }
  0x34   : > { %296 = vst.msk [vmem:[#allocation2 + $0x109] sm:$0xff] %vm201_vm0, %v264_v4  ;;  %297 = vst.msk [vmem:[#allocation2 + $0x111] sm:$0xff] %vm201_vm0, %v265_v5  ;;  %4885 = vmatmul.mubr.msk.f32.gmra.mrb[2].mxu1 %vm201_vm0, %v347_v16  ;;  %5106 = vmatmul.mubr.msk.f32.vlgmr.msra.gmra.mrb[0].mxu0 %vm201_vm0, %v347_v16  ;;  %v272_v25 = vmax.f32 %v197_v23, 0.0  ;;  %v273_v26 = vmax.f32 %v198_v24, 0.0  ;;  %v4386_v27 = vld [vmem:[%s7203_s1 + $0xc0] sm:$0xff]  ;;  %v4387_v28 = vld [vmem:[%s7203_s1 + $0xc8] sm:$0xff] }
  0x35   : > { %298 = vst.msk [vmem:[#allocation2 + $0x121] sm:$0xff] %vm201_vm0, %v266_v9  ;;  %299 = vst.msk [vmem:[#allocation2 + $0x129] sm:$0xff] %vm201_vm0, %v267_v10  ;;  %5500 = vmatpush3.bf16.msra.mxu0 %v6108_v17  ;;  %4887 = vmatprep.mubr.msk.f32.mxu1 %vm201_vm0, %v348_v18  ;;  %v349_v29 = vld [vmem:[#allocation2 + $0x39] sm:$0xff]  ;;  %v350_v30 = vld [vmem:[#allocation2 + $0x49] sm:$0xff]  ;;  %v6202_v31 = vpack.c.bf16 %v4387_v28, %v4386_v27  ;;  %s5891_s11 = scalar_lea.vmem %s7152_s6, 4096  ;;  %s5895_s19 = sshll.u32 %s5956_s17, 4  ;;  %s5896_s19 = int_to_ptr.vmem [resolvable:$false] %s5895_s19 }
  0x36   : > { %300 = vst.msk [vmem:[#allocation2 + $0x139] sm:$0xff] %vm201_vm0, %v268_v11  ;;  %301 = vst.msk [vmem:[#allocation2 + $0x141] sm:$0xff] %vm201_vm0, %v269_v20  ;;  %5108 = vmatprep.mubr.msk.f32.mxu0 %vm201_vm0, %v348_v18  ;;  %5502 = vmatprep.subr.bf16.mxu0 %v5501_v19  ;;  %v351_v17 = vld [vmem:[#allocation2 + $0x51] sm:$0xff]  ;;  %v352_v32 = vld [vmem:[#allocation2 + $0x61] sm:$0xff]  ;;  %p5892_p11 = scmp.ne.s32.totalorder %s7152_s6, %s5891_s11  ;;  %s5897_s20 = scalar_lea.vmem %s5896_s19, 8192 }
  0x37   : > { %302 = vst.msk [vmem:[#allocation2 + $0x151] sm:$0xff] %vm201_vm0, %v270_v21  ;;  %303 = vst.msk [vmem:[#allocation2 + $0x159] sm:$0xff] %vm201_vm0, %v271_v22  ;;  %v199_v33 = vld [vmem:[%s6106_s7 + $0xf0] sm:$0xff]  ;;  %v200_v36 = vld [vmem:[%s6106_s7 + $0xf8] sm:$0xff]  ;;  %p5898_p0 = scmp.lt.s32.totalorder %s7152_s6, %s5896_s19  ;;  %p5899_p1 = scmp.lt.s32.totalorder %s5897_s20, %s5891_s11 }
  0x38   : > { %304 = vst.msk [vmem:[#allocation2 + $0x169] sm:$0xff] %vm201_vm0, %v272_v25  ;;  %305 = vst.msk [vmem:[#allocation2 + $0x171] sm:$0xff] %vm201_vm0, %v273_v26  ;;  %4888 = vmatmul.mubr.msk.f32.gmra.mrb[4].mxu1 %vm201_vm0, %v349_v29  ;;  %5109 = vmatmul.mubr.msk.f32.gmra.mrb[2].mxu0 %vm201_vm0, %v349_v29  ;;  %v353_v34 = vld [vmem:[#allocation2 + $0x69] sm:$0xff]  ;;  %v274_v35 = vmax.f32 %v199_v33, 0.0  ;;  %v354_v37 = vld [vmem:[#allocation2 + $0x79] sm:$0xff]  ;;  %v275_v38 = vmax.f32 %v200_v36, 0.0  ;;  %p5893_p12 = pnand %p5892_p11, %p6017_p5 }
  0x39   : > { %4890 = vmatprep.mubr.msk.f32.mxu1 %vm201_vm0, %v350_v30  ;;  %5111 = vmatprep.mubr.msk.f32.mxu0 %vm201_vm0, %v350_v30  ;;  %v355_v39 = vld [vmem:[#allocation2 + $0x81] sm:$0xff]  ;;  %v356_v40 = vld [vmem:[#allocation2 + $0x91] sm:$0xff]  ;;  %v357_v41 = vld [vmem:[#allocation2 + $0x99] sm:$0xff]  ;;  %p5900_p2 = por %p5899_p1, %p5898_p0 }
  0x3a   : > { %5504 = vmatpush3.bf16.msra.mxu0 %v5501_v19  ;;  %306 = vst.msk [vmem:[#allocation2 + $0x181] sm:$0xff] %vm201_vm0, %v274_v35  ;;  %307 = vst.msk [vmem:[#allocation2 + $0x189] sm:$0xff] %vm201_vm0, %v275_v38  ;;  %v358_v42 = vld [vmem:[#allocation2 + $0xa9] sm:$0xff]  ;;  %v359_v43 = vld [vmem:[#allocation2 + $0xb1] sm:$0xff]  ;;  %p5894_p13 = pneg %p5893_p12 }
  0x3b   : > { %5506 = vmatprep.subr.bf16.mxu0 %v6202_v31  ;;  %v360_v44 = vld [vmem:[#allocation2 + $0xc1] sm:$0xff]  ;;  %v361_v45 = vld [vmem:[#allocation2 + $0xc9] sm:$0xff]  ;;  %v362_v46 = vld [vmem:[#allocation2 + $0xd9] sm:$0xff] }
  0x3c   : > { %4891 = vmatmul.mubr.msk.f32.gmra.mrb[6].mxu1 %vm201_vm0, %v351_v17  ;;  %5112 = vmatmul.mubr.msk.f32.gmra.mrb[4].mxu0 %vm201_vm0, %v351_v17  ;;  %v4242_v47 = vld [vmem:[%s7203_s1 + $0x40] sm:$0xff]  ;;  %v4243_v49 = vld [vmem:[%s7203_s1 + $0x48] sm:$0xff]  ;;  %v6245_v50 = vld [vmem:[#allocation2 + $0xf1] sm:$0xff]  ;;  %p5901_p3 = pnand %p5900_p2, %p5894_p13 }
  0x3d   : > { %4893 = vmatprep.mubr.msk.f32.mxu1 %vm201_vm0, %v352_v32  ;;  %5114 = vmatprep.mubr.msk.f32.mxu0 %vm201_vm0, %v352_v32  ;;  %v6240_v48 = vld [vmem:[#allocation2 + $0xe1] sm:$0xff]  ;;  %7238 = vst [vmem:[#allocation7_spill] sm:$0xff] %v6245_v50  ;;  %v5473_v51 = vpack.c.bf16 %v4243_v49, %v4242_v47  ;;  %v6255_v52 = vld [vmem:[#allocation2 + $0xf9] sm:$0xff]  ;;  %v6257_v53 = vld [vmem:[#allocation2 + $0x109] sm:$0xff] }
  0x3e   : > { %7237 = vst [vmem:[#allocation6_spill] sm:$0xff] %v6240_v48  ;;  %7239 = vst [vmem:[#allocation8_spill] sm:$0xff] %v6255_v52  ;;  %v6267_v54 = vld [vmem:[#allocation2 + $0x111] sm:$0xff]  ;;  %v6269_v55 = vld [vmem:[#allocation2 + $0x121] sm:$0xff] }
  0x3f   : > { %7240 = vst [vmem:[#allocation9_spill] sm:$0xff] %v6257_v53  ;;  %5474 = vmatprep.subr.bf16.mxu1 %v5473_v51  ;;  %7241 = vst [vmem:[#allocation10_spill] sm:$0xff] %v6267_v54  ;;  %v6279_v56 = vld [vmem:[#allocation2 + $0x129] sm:$0xff]  ;;  %v6281_v57 = vld [vmem:[#allocation2 + $0x139] sm:$0xff] }
  0x40   : > { %4894 = vmatmul.mubr.msk.f32.gmra.mrb[8].mxu1 %vm201_vm0, %v353_v34  ;;  %5115 = vmatmul.mubr.msk.f32.gmra.mrb[6].mxu0 %vm201_vm0, %v353_v34  ;;  %7242 = vst [vmem:[#allocation11_spill] sm:$0xff] %v6269_v55  ;;  %7243 = vst [vmem:[#allocation12_spill] sm:$0xff] %v6279_v56  ;;  %v6291_v58 = vld [vmem:[#allocation2 + $0x141] sm:$0xff]  ;;  %v6293_v59 = vld [vmem:[#allocation2 + $0x151] sm:$0xff] }
  0x41   : > { %4896 = vmatprep.mubr.msk.f32.mxu1 %vm201_vm0, %v354_v37  ;;  %5117 = vmatprep.mubr.msk.f32.mxu0 %vm201_vm0, %v354_v37  ;;  %7244 = vst [vmem:[#allocation13_spill] sm:$0xff] %v6281_v57  ;;  %7245 = vst [vmem:[#allocation14_spill] sm:$0xff] %v6291_v58  ;;  %v6303_v60 = vld [vmem:[#allocation2 + $0x159] sm:$0xff]  ;;  %v6305_v61 = vld [vmem:[#allocation2 + $0x169] sm:$0xff] }
  0x42   : > { %7246 = vst [vmem:[#allocation15_spill] sm:$0xff] %v6293_v59  ;;  %7247 = vst [vmem:[#allocation16_spill] sm:$0xff] %v6303_v60  ;;  %v6315_v62 = vld [vmem:[#allocation2 + $0x171] sm:$0xff]  ;;  %v308_v63 = vld [vmem:[#allocation2] sm:$0xff] }
  0x43   : > { %7248 = vst [vmem:[#allocation17_spill] sm:$0xff] %v6305_v61  ;;  %7249 = vst [vmem:[#allocation18_spill] sm:$0xff] %v6315_v62  ;;  %v6317_v0 = vld [vmem:[#allocation2 + $0x181] sm:$0xff]  ;;  %v4244_v1 = vld [vmem:[%s7203_s1 + $0x50] sm:$0xff] }
  0x44   : > { %4897 = vmatmul.mubr.msk.f32.gmra.mrb[10].mxu1 %vm201_vm0, %v355_v39  ;;  %5118 = vmatmul.mubr.msk.f32.gmra.mrb[8].mxu0 %vm201_vm0, %v355_v39  ;;  %7250 = vst [vmem:[#allocation19_spill] sm:$0xff] %v6317_v0  ;;  %v4245_v2 = vld [vmem:[%s7203_s1 + $0x58] sm:$0xff]  ;;  %v309_v3 = vld [vmem:[#allocation2 + $0x8] sm:$0xff]  ;;  %v4388_v7 = vld [vmem:[%s7203_s1 + $0xd0] sm:$0xff] }
  0x45   : > { %4899 = vmatprep.mubr.msk.f32.mxu1 %vm201_vm0, %v356_v40  ;;  %5120 = vmatprep.mubr.msk.f32.mxu0 %vm201_vm0, %v356_v40  ;;  %v6332_v4 = vld [vmem:[#allocation2 + $0x189] sm:$0xff]  ;;  %v6334_v5 = vld [vmem:[#allocation2 + $0x18] sm:$0xff]  ;;  %v5477_v9 = vpack.c.bf16 %v4245_v2, %v4244_v1  ;;  %v6351_v10 = vld [vmem:[#allocation2 + $0x20] sm:$0xff] }
  0x46   : > { %7251 = vst [vmem:[#allocation20_spill] sm:$0xff] %v6332_v4  ;;  %7252 = vst [vmem:[#allocation21_spill] sm:$0xff] %v6334_v5  ;;  %v6336_v6 = vld [vmem:[#allocation2 + $0x1a] sm:$0xff]  ;;  %v6353_v11 = vld [vmem:[#allocation2 + $0x22] sm:$0xff] }
  0x47   : > { %v4389_v8 = vld [vmem:[%s7203_s1 + $0xd8] sm:$0xff]  ;;  %7253 = vst [vmem:[#allocation22_spill] sm:$0xff] %v6351_v10  ;;  %v6355_v12 = vld [vmem:[#allocation2 + $0x30] sm:$0xff]  ;;  %v4278_v15 = vld [vmem:[%s7203_s1 + $0x60] sm:$0xff] }
  0x48   : > { %4900 = vmatmul.mubr.msk.f32.gmra.mrb[12].mxu1 %vm201_vm0, %v357_v41  ;;  %5121 = vmatmul.mubr.msk.f32.gmra.mrb[10].mxu0 %vm201_vm0, %v357_v41  ;;  %v5509_v13 = vpack.c.bf16 %v4389_v8, %v4388_v7  ;;  %v6357_v14 = vld [vmem:[#allocation2 + $0x32] sm:$0xff]  ;;  %v4279_v16 = vld [vmem:[%s7203_s1 + $0x68] sm:$0xff]  ;;  %v4422_v18 = vld [vmem:[%s7203_s1 + $0xe0] sm:$0xff] }
  0x49   : > { %4902 = vmatprep.mubr.msk.f32.mxu1 %vm201_vm0, %v358_v42  ;;  %5123 = vmatprep.mubr.msk.f32.mxu0 %vm201_vm0, %v358_v42  ;;  %v4423_v19 = vld [vmem:[%s7203_s1 + $0xe8] sm:$0xff]  ;;  %v6378_v20 = vld [vmem:[#allocation2 + $0x38] sm:$0xff]  ;;  %v6388_v24 = vpack.c.bf16 %v4279_v16, %v4278_v15  ;;  %v6400_v26 = vld [vmem:[#allocation2 + $0x50] sm:$0xff] }
  0x4a   : > { %v6380_v21 = vld [vmem:[#allocation2 + $0x3a] sm:$0xff]  ;;  %v6384_v22 = vld [vmem:[#allocation2 + $0x48] sm:$0xff]  ;;  %v6390_v25 = vpack.c.bf16 %v4423_v19, %v4422_v18  ;;  %v6402_v27 = vld [vmem:[#allocation2 + $0x52] sm:$0xff] }
  0x4b   : > { %v6386_v23 = vld [vmem:[#allocation2 + $0x4a] sm:$0xff]  ;;  %v6404_v28 = vld [vmem:[#allocation2 + $0x60] sm:$0xff]  ;;  %v6422_v17 = vld [vmem:[#allocation2 + $0x78] sm:$0xff] }
  0x4c   : > { %4903 = vmatmul.mubr.msk.f32.gmra.mrb[14].mxu1 %vm201_vm0, %v359_v43  ;;  %5124 = vmatmul.mubr.msk.f32.gmra.mrb[12].mxu0 %vm201_vm0, %v359_v43  ;;  %v6406_v29 = vld [vmem:[#allocation2 + $0x62] sm:$0xff]  ;;  %v6424_v32 = vld [vmem:[#allocation2 + $0x7a] sm:$0xff]  ;;  %v6438_v35 = vld [vmem:[#allocation2 + $0x90] sm:$0xff] }
  0x4d   : > { %4905 = vmatprep.mubr.msk.f32.mxu1 %vm201_vm0, %v360_v44  ;;  %5126 = vmatprep.mubr.msk.f32.mxu0 %vm201_vm0, %v360_v44  ;;  %v6418_v30 = vld [vmem:[#allocation2 + $0x68] sm:$0xff]  ;;  %v6434_v33 = vld [vmem:[#allocation2 + $0x80] sm:$0xff]  ;;  %v6440_v36 = vld [vmem:[#allocation2 + $0x92] sm:$0xff] }
  0x4e   : > { %v6436_v34 = vld [vmem:[#allocation2 + $0x82] sm:$0xff]  ;;  %v6450_v37 = vld [vmem:[#allocation2 + $0x98] sm:$0xff]  ;;  %v6456_v40 = vld [vmem:[#allocation2 + $0xaa] sm:$0xff] }
  0x4f   : > { %v6452_v38 = vld [vmem:[#allocation2 + $0x9a] sm:$0xff]  ;;  %v6454_v39 = vld [vmem:[#allocation2 + $0xa8] sm:$0xff]  ;;  %v6466_v41 = vld [vmem:[#allocation2 + $0xb0] sm:$0xff] }
  0x50   : > { %4906 = vmatmul.mubr.msk.f32.gmra.mrb[16].mxu1 %vm201_vm0, %v361_v45  ;;  %5127 = vmatmul.mubr.msk.f32.gmra.mrb[14].mxu0 %vm201_vm0, %v361_v45  ;;  %v6468_v42 = vld [vmem:[#allocation2 + $0xb2] sm:$0xff]  ;;  %v6470_v43 = vld [vmem:[#allocation2 + $0xc0] sm:$0xff]  ;;  %v6482_v45 = vld [vmem:[#allocation2 + $0xc8] sm:$0xff] }
  0x51   : > { %4908 = vmatprep.mubr.msk.f32.mxu1 %vm201_vm0, %v362_v46  ;;  %5129 = vmatprep.mubr.msk.f32.mxu0 %vm201_vm0, %v362_v46  ;;  %v6472_v44 = vld [vmem:[#allocation2 + $0xc2] sm:$0xff]  ;;  %v6484_v46 = vld [vmem:[#allocation2 + $0xca] sm:$0xff]  ;;  %v6486_v47 = vld [vmem:[#allocation2 + $0xd8] sm:$0xff] }
  0x52   : > { %v6488_v49 = vld [vmem:[#allocation2 + $0xda] sm:$0xff]  ;;  %v6502_v1 = vld [vmem:[#allocation2 + $0xf0] sm:$0xff]  ;;  %v6518_v8 = vld [vmem:[#allocation2 + $0x108] sm:$0xff] }
  0x53   : > { %v6504_v2 = vld [vmem:[#allocation2 + $0xf2] sm:$0xff]  ;;  %v6516_v7 = vld [vmem:[#allocation2 + $0xfa] sm:$0xff]  ;;  %v6536_v18 = vld [vmem:[#allocation2 + $0x122] sm:$0xff] }
  0x54   : > { %4909 = vmatmul.mubr.msk.f32.gmra.mrb[18].mxu1 %vm201_vm0, %v6240_v48  ;;  %5130 = vmatmul.mubr.msk.f32.gmra.mrb[16].mxu0 %vm201_vm0, %v6240_v48  ;;  %v6532_v15 = vld [vmem:[#allocation2 + $0x112] sm:$0xff]  ;;  %v6534_v16 = vld [vmem:[#allocation2 + $0x120] sm:$0xff]  ;;  %v6546_v19 = vld [vmem:[#allocation2 + $0x128] sm:$0xff] }
  0x55   : > { %4911 = vmatprep.mubr.msk.f32.mxu1 %vm201_vm0, %v6245_v50  ;;  %5132 = vmatprep.mubr.msk.f32.mxu0 %vm201_vm0, %v6245_v50  ;;  %v1023_v50 = vld [vmem:[#allocation2 + $0x2] sm:$0xff] }
  0x56   : > { %v6598_v48 = vld [vmem:[#allocation2 + $0x182] sm:$0xff] }
  0x57   : > { %7259 = vst [vmem:[#allocation28_spill] sm:$0xff] %v6598_v48 }
  0x58   : > { %4912 = vmatmul.mubr.msk.f32.gmra.mrb[20].mxu1 %vm201_vm0, %v6255_v52  ;;  %5133 = vmatmul.mubr.msk.f32.gmra.mrb[18].mxu0 %vm201_vm0, %v6255_v52  ;;  %v6596_v52 = vld [vmem:[#allocation2 + $0x172] sm:$0xff] }
  0x59   : > { %4914 = vmatprep.mubr.msk.f32.mxu1 %vm201_vm0, %v6257_v53  ;;  %5135 = vmatprep.mubr.msk.f32.mxu0 %vm201_vm0, %v6257_v53  ;;  %v6594_v53 = vld [vmem:[#allocation2 + $0x170] sm:$0xff]  ;;  %7258 = vst [vmem:[#allocation27_spill] sm:$0xff] %v6596_v52 }
  0x5a   : > { %7257 = vst [vmem:[#allocation26_spill] sm:$0xff] %v6594_v53 }
  0x5c   : > { %4915 = vmatmul.mubr.msk.f32.gmra.mrb[22].mxu1 %vm201_vm0, %v6267_v54  ;;  %5136 = vmatmul.mubr.msk.f32.gmra.mrb[20].mxu0 %vm201_vm0, %v6267_v54  ;;  %v6584_v54 = vld [vmem:[#allocation2 + $0x16a] sm:$0xff] }
  0x5d   : > { %4917 = vmatprep.mubr.msk.f32.mxu1 %vm201_vm0, %v6269_v55  ;;  %5138 = vmatprep.mubr.msk.f32.mxu0 %vm201_vm0, %v6269_v55  ;;  %v6582_v55 = vld [vmem:[#allocation2 + $0x168] sm:$0xff]  ;;  %7256 = vst [vmem:[#allocation25_spill] sm:$0xff] %v6584_v54 }
  0x5e   : > { %7255 = vst [vmem:[#allocation24_spill] sm:$0xff] %v6582_v55 }
  0x60   : > { %4918 = vmatmul.mubr.msk.f32.gmra.mrb[24].mxu1 %vm201_vm0, %v6279_v56  ;;  %5139 = vmatmul.mubr.msk.f32.gmra.mrb[22].mxu0 %vm201_vm0, %v6279_v56  ;;  %v6580_v56 = vld [vmem:[#allocation2 + $0x15a] sm:$0xff] }
  0x61   : > { %4920 = vmatprep.mubr.msk.f32.mxu1 %vm201_vm0, %v6281_v57  ;;  %5141 = vmatprep.mubr.msk.f32.mxu0 %vm201_vm0, %v6281_v57  ;;  %v6578_v57 = vld [vmem:[#allocation2 + $0x158] sm:$0xff]  ;;  %7254 = vst [vmem:[#allocation23_spill] sm:$0xff] %v6580_v56 }
  0x64   : > { %4921 = vmatmul.mubr.msk.f32.gmra.mrb[26].mxu1 %vm201_vm0, %v6291_v58  ;;  %5142 = vmatmul.mubr.msk.f32.gmra.mrb[24].mxu0 %vm201_vm0, %v6291_v58  ;;  %v6568_v58 = vld [vmem:[#allocation2 + $0x152] sm:$0xff] }
  0x65   : > { %4923 = vmatprep.mubr.msk.f32.mxu1 %vm201_vm0, %v6293_v59  ;;  %5144 = vmatprep.mubr.msk.f32.mxu0 %vm201_vm0, %v6293_v59  ;;  %v6566_v59 = vld [vmem:[#allocation2 + $0x150] sm:$0xff] }
  0x68   : > { %4924 = vmatmul.mubr.msk.f32.gmra.mrb[28].mxu1 %vm201_vm0, %v6303_v60  ;;  %5145 = vmatmul.mubr.msk.f32.gmra.mrb[26].mxu0 %vm201_vm0, %v6303_v60  ;;  %v6564_v60 = vld [vmem:[#allocation2 + $0x142] sm:$0xff] }
  0x69   : > { %4926 = vmatprep.mubr.msk.f32.mxu1 %vm201_vm0, %v6305_v61  ;;  %5147 = vmatprep.mubr.msk.f32.mxu0 %vm201_vm0, %v6305_v61  ;;  %v6562_v61 = vld [vmem:[#allocation2 + $0x140] sm:$0xff] }
  0x6c   : > { %4927 = vmatmul.mubr.msk.f32.gmra.mrb[30].mxu1 %vm201_vm0, %v6315_v62  ;;  %5148 = vmatmul.mubr.msk.f32.gmra.mrb[28].mxu0 %vm201_vm0, %v6315_v62  ;;  %v6552_v62 = vld [vmem:[#allocation2 + $0x13a] sm:$0xff] }
  0x6d   : > { %4937 = vmatprep.mubr.msk.f32.mxu1 %vm201_vm0, %v308_v63  ;;  %5150 = vmatprep.mubr.msk.f32.mxu0 %vm201_vm0, %v6317_v0  ;;  %v6500_v63 = vld [vmem:[#allocation2 + $0xe2] sm:$0xff]  ;;  %v6550_v0 = vld [vmem:[#allocation2 + $0x138] sm:$0xff] }
  0x70   : > { %4938 = vmatmul.mubr.msk.f32.vlgmr.msra.gmra.mrb[0].mxu1 %vm201_vm0, %v309_v3  ;;  %5151 = vmatmul.mubr.msk.f32.gmra.mrb[30].mxu0 %vm201_vm0, %v6332_v4  ;;  %v6514_v3 = vld [vmem:[#allocation2 + $0xf8] sm:$0xff]  ;;  %v6548_v4 = vld [vmem:[#allocation2 + $0x12a] sm:$0xff] }
  0x71   : > { %4940 = vmatprep.mubr.msk.f32.mxu1 %vm201_vm0, %v6334_v5  ;;  %5161 = vmatprep.mubr.msk.f32.mxu0 %vm201_vm0, %v6336_v6  ;;  %v4281_v5 = vld [vmem:[%s7203_s1 + $0x78] sm:$0xff] }
  0x72   : > { %5476 = vmatpush3.bf16.msra.mxu1 %v5473_v51  ;;  %v6498_v51 = vld [vmem:[#allocation2 + $0xe0] sm:$0xff] }
  0x73   : > { %5478 = vmatprep.subr.bf16.mxu1 %v5477_v9 }
  0x74   : > { %4941 = vmatmul.mubr.msk.f32.gmra.mrb[2].mxu1 %vm201_vm0, %v6351_v10  ;;  %5162 = vmatmul.mubr.msk.f32.vlgmr.msra.gmra.mrb[0].mxu0 %vm201_vm0, %v6353_v11  ;;  %v4280_v10 = vld [vmem:[%s7203_s1 + $0x70] sm:$0xff] }
  0x75   : > { %5508 = vmatpush3.bf16.msra.mxu0 %v6202_v31  ;;  %4943 = vmatprep.mubr.msk.f32.mxu1 %vm201_vm0, %v6355_v12  ;;  %v6420_v31 = vld [vmem:[#allocation2 + $0x6a] sm:$0xff] }
  0x76   : > { %5164 = vmatprep.mubr.msk.f32.mxu0 %vm201_vm0, %v6357_v14  ;;  %5510 = vmatprep.subr.bf16.mxu0 %v5509_v13 }
  0x77   : > { %5480 = vmatpush3.bf16.msra.mxu1 %v5477_v9  ;;  %v6520_v9 = vld [vmem:[#allocation2 + $0x10a] sm:$0xff] }
  0x78   : > { %4944 = vmatmul.mubr.msk.f32.gmra.mrb[4].mxu1 %vm201_vm0, %v6378_v20  ;;  %5165 = vmatmul.mubr.msk.f32.gmra.mrb[2].mxu0 %vm201_vm0, %v6380_v21 }
  0x79   : > { %4946 = vmatprep.mubr.msk.f32.mxu1 %vm201_vm0, %v6384_v22  ;;  %5167 = vmatprep.mubr.msk.f32.mxu0 %vm201_vm0, %v6386_v23 }
  0x7a   : > { %5512 = vmatpush3.bf16.msra.mxu0 %v5509_v13  ;;  %5482 = vmatprep.subr.bf16.mxu1 %v6388_v24  ;;  %v6530_v13 = vld [vmem:[#allocation2 + $0x110] sm:$0xff] }
  0x7b   : > { %5514 = vmatprep.subr.bf16.mxu0 %v6390_v25 }
  0x7c   : > { %4947 = vmatmul.mubr.msk.f32.gmra.mrb[6].mxu1 %vm201_vm0, %v6400_v26  ;;  %5168 = vmatmul.mubr.msk.f32.gmra.mrb[4].mxu0 %vm201_vm0, %v6402_v27 }
  0x7d   : > { %4949 = vmatprep.mubr.msk.f32.mxu1 %vm201_vm0, %v6404_v28  ;;  %5170 = vmatprep.mubr.msk.f32.mxu0 %vm201_vm0, %v6406_v29 }
  0x80   : > { %4950 = vmatmul.mubr.msk.f32.gmra.mrb[8].mxu1 %vm201_vm0, %v6418_v30  ;;  %5171 = vmatmul.mubr.msk.f32.gmra.mrb[6].mxu0 %vm201_vm0, %v6420_v31 }
  0x81   : > { %4952 = vmatprep.mubr.msk.f32.mxu1 %vm201_vm0, %v6422_v17  ;;  %5173 = vmatprep.mubr.msk.f32.mxu0 %vm201_vm0, %v6424_v32 }
  0x84   : > { %4953 = vmatmul.mubr.msk.f32.gmra.mrb[10].mxu1 %vm201_vm0, %v6434_v33  ;;  %5174 = vmatmul.mubr.msk.f32.gmra.mrb[8].mxu0 %vm201_vm0, %v6436_v34 }
  0x85   : > { %4955 = vmatprep.mubr.msk.f32.mxu1 %vm201_vm0, %v6438_v35  ;;  %5176 = vmatprep.mubr.msk.f32.mxu0 %vm201_vm0, %v6440_v36 }
  0x88   : > { %4956 = vmatmul.mubr.msk.f32.gmra.mrb[12].mxu1 %vm201_vm0, %v6450_v37  ;;  %5177 = vmatmul.mubr.msk.f32.gmra.mrb[10].mxu0 %vm201_vm0, %v6452_v38 }
  0x89   : > { %4958 = vmatprep.mubr.msk.f32.mxu1 %vm201_vm0, %v6454_v39  ;;  %5179 = vmatprep.mubr.msk.f32.mxu0 %vm201_vm0, %v6456_v40 }
  0x8c   : > { %4959 = vmatmul.mubr.msk.f32.gmra.mrb[14].mxu1 %vm201_vm0, %v6466_v41  ;;  %5180 = vmatmul.mubr.msk.f32.gmra.mrb[12].mxu0 %vm201_vm0, %v6468_v42 }
  0x8d   : > { %4961 = vmatprep.mubr.msk.f32.mxu1 %vm201_vm0, %v6470_v43  ;;  %5182 = vmatprep.mubr.msk.f32.mxu0 %vm201_vm0, %v6472_v44 }
  0x90   : > { %4962 = vmatmul.mubr.msk.f32.gmra.mrb[16].mxu1 %vm201_vm0, %v6482_v45  ;;  %5183 = vmatmul.mubr.msk.f32.gmra.mrb[14].mxu0 %vm201_vm0, %v6484_v46 }
  0x91   : > { %4964 = vmatprep.mubr.msk.f32.mxu1 %vm201_vm0, %v6486_v47  ;;  %5185 = vmatprep.mubr.msk.f32.mxu0 %vm201_vm0, %v6488_v49 }
  0x94   : > { %4965 = vmatmul.mubr.msk.f32.gmra.mrb[18].mxu1 %vm201_vm0, %v6498_v51  ;;  %5186 = vmatmul.mubr.msk.f32.gmra.mrb[16].mxu0 %vm201_vm0, %v6500_v63 }
  0x95   : > { %4967 = vmatprep.mubr.msk.f32.mxu1 %vm201_vm0, %v6502_v1  ;;  %5188 = vmatprep.mubr.msk.f32.mxu0 %vm201_vm0, %v6504_v2 }
  0x98   : > { %4968 = vmatmul.mubr.msk.f32.gmra.mrb[20].mxu1 %vm201_vm0, %v6514_v3  ;;  %5189 = vmatmul.mubr.msk.f32.gmra.mrb[18].mxu0 %vm201_vm0, %v6516_v7 }
  0x99   : > { %4970 = vmatprep.mubr.msk.f32.mxu1 %vm201_vm0, %v6518_v8  ;;  %5191 = vmatprep.mubr.msk.f32.mxu0 %vm201_vm0, %v6520_v9 }
  0x9c   : > { %4971 = vmatmul.mubr.msk.f32.gmra.mrb[22].mxu1 %vm201_vm0, %v6530_v13  ;;  %5192 = vmatmul.mubr.msk.f32.gmra.mrb[20].mxu0 %vm201_vm0, %v6532_v15 }
  0x9d   : > { %4973 = vmatprep.mubr.msk.f32.mxu1 %vm201_vm0, %v6534_v16  ;;  %5194 = vmatprep.mubr.msk.f32.mxu0 %vm201_vm0, %v6536_v18 }
  0xa0   : > { %4974 = vmatmul.mubr.msk.f32.gmra.mrb[24].mxu1 %vm201_vm0, %v6546_v19  ;;  %5195 = vmatmul.mubr.msk.f32.gmra.mrb[22].mxu0 %vm201_vm0, %v6548_v4 }
  0xa1   : > { %4976 = vmatprep.mubr.msk.f32.mxu1 %vm201_vm0, %v6550_v0  ;;  %5197 = vmatprep.mubr.msk.f32.mxu0 %vm201_vm0, %v6552_v62 }
  0xa4   : > { %4977 = vmatmul.mubr.msk.f32.gmra.mrb[26].mxu1 %vm201_vm0, %v6562_v61  ;;  %5198 = vmatmul.mubr.msk.f32.gmra.mrb[24].mxu0 %vm201_vm0, %v6564_v60 }
  0xa5   : > { %4979 = vmatprep.mubr.msk.f32.mxu1 %vm201_vm0, %v6566_v59  ;;  %5200 = vmatprep.mubr.msk.f32.mxu0 %vm201_vm0, %v6568_v58 }
  0xa8   : > { %4980 = vmatmul.mubr.msk.f32.gmra.mrb[28].mxu1 %vm201_vm0, %v6578_v57  ;;  %5201 = vmatmul.mubr.msk.f32.gmra.mrb[26].mxu0 %vm201_vm0, %v6580_v56  ;;  %v6613_v56 = vld [vmem:[#allocation2 + $0x18a] sm:$0xff] }
  0xa9   : > { %4982 = vmatprep.mubr.msk.f32.mxu1 %vm201_vm0, %v6582_v55  ;;  %5203 = vmatprep.mubr.msk.f32.mxu0 %vm201_vm0, %v6584_v54  ;;  %v1024_v54 = vld [vmem:[#allocation2 + $0xa] sm:$0xff]  ;;  %7260 = vst [vmem:[#allocation29_spill] sm:$0xff] %v6613_v56  ;;  %v5485_v55 = vpack.c.bf16 %v4281_v5, %v4280_v10 }
  0xaa   : > { %v4459_v5 = vld [vmem:[%s7203_s1 + $0x108] sm:$0xff]  ;;  %v7263_v10 = vld [vmem:[#allocation26_spill] sm:$0xff] }
  0xac   : > { %4983 = vmatmul.mubr.msk.f32.gmra.mrb[30].mxu1 %vm201_vm0, %v6594_v53  ;;  %5204 = vmatmul.mubr.msk.f32.gmra.mrb[28].mxu0 %vm201_vm0, %v6596_v52  ;;  %v4424_v52 = vld [vmem:[%s7203_s1 + $0xf0] sm:$0xff]  ;;  %v4425_v53 = vld [vmem:[%s7203_s1 + $0xf8] sm:$0xff] }
  0xad   : > { %4993 = vmatprep.mubr.msk.f32.mxu1 %vm201_vm0, %v1023_v50  ;;  %5206 = vmatprep.mubr.msk.f32.mxu0 %vm201_vm0, %v6598_v48  ;;  %v5517_v50 = vpack.c.bf16 %v4425_v53, %v4424_v52  ;;  %v7261_v53 = vld [vmem:[#allocation24_spill] sm:$0xff]  ;;  %v4460_v48 = vld [vmem:[%s7203_s1 + $0x110] sm:$0xff] }
  0xb0   : > { %4994 = vmatmul.mubr.msk.f32.vlgmr.msra.gmra.mrb[0].mxu1 %vm201_vm0, %v1024_v54  ;;  %5207 = vmatmul.mubr.msk.f32.gmra.mrb[30].mxu0 %vm201_vm0, %v6613_v56  ;;  %v4458_v54 = vld [vmem:[%s7203_s1 + $0x100] sm:$0xff]  ;;  %v2974_v56 = vld [vmem:[#allocation2 + $0x31] sm:$0xff] }
  0xb1   : > { %4996 = vmatprep.mubr.msk.f32.mxu1 %vm201_vm0, %v6336_v6  ;;  %5217 = vmatprep.mubr.msk.f32.mxu0 %vm201_vm0, %v6355_v12  ;;  %v6644_v52 = vpack.c.bf16 %v4459_v5, %v4458_v54  ;;  %v7262_v6 = vld [vmem:[#allocation23_spill] sm:$0xff]  ;;  %v7266_v54 = vld [vmem:[#allocation21_spill] sm:$0xff]  ;;  %v2615_v5 = vld [vmem:[#allocation2 + $0x1a0] sm:$0xff] }
  0xb2   : > { %5484 = vmatpush3.bf16.msra.mxu1 %v6388_v24  ;;  %v6753_v24 = vld [vmem:[#allocation2 + $0x188] sm:$0xff] }
  0xb3   : > { %5486 = vmatprep.subr.bf16.mxu1 %v5485_v55 }
  0xb4   : > { %4997 = vmatmul.mubr.msk.f32.gmra.mrb[2].mxu1 %vm201_vm0, %v6353_v11  ;;  %5218 = vmatmul.mubr.msk.f32.vlgmr.msra.gmra.mrb[0].mxu0 %vm201_vm0, %v6378_v20  ;;  %v7264_v11 = vld [vmem:[#allocation25_spill] sm:$0xff] }
  0xb5   : > { %5516 = vmatpush3.bf16.msra.mxu0 %v6390_v25  ;;  %4999 = vmatprep.mubr.msk.f32.mxu1 %vm201_vm0, %v6357_v14  ;;  %v2614_v25 = vld [vmem:[#allocation2 + $0x198] sm:$0xff] }
  0xb6   : > { %5220 = vmatprep.mubr.msk.f32.mxu0 %vm201_vm0, %v6384_v22  ;;  %5518 = vmatprep.subr.bf16.mxu0 %v5517_v50 }
  0xb7   : > { %5488 = vmatpush3.bf16.msra.mxu1 %v5485_v55  ;;  %v6743_v55 = vld [vmem:[#allocation2 + $0x180] sm:$0xff] }
  0xb8   : > { %5000 = vmatmul.mubr.msk.f32.gmra.mrb[4].mxu1 %vm201_vm0, %v6380_v21  ;;  %5221 = vmatmul.mubr.msk.f32.gmra.mrb[2].mxu0 %vm201_vm0, %v6400_v26 }
  0xb9   : > { %5002 = vmatprep.mubr.msk.f32.mxu1 %vm201_vm0, %v6386_v23  ;;  %5223 = vmatprep.mubr.msk.f32.mxu0 %vm201_vm0, %v6404_v28 }
  0xba   : > { %5520 = vmatpush3.bf16.msra.mxu0 %v5517_v50  ;;  %v7265_v50 = vld [vmem:[#allocation27_spill] sm:$0xff] }
  0xbb   : > { %5522 = vmatprep.subr.bf16.mxu0 %v6644_v52 }
  0xbc   : > { %5003 = vmatmul.mubr.msk.f32.gmra.mrb[6].mxu1 %vm201_vm0, %v6402_v27  ;;  %5224 = vmatmul.mubr.msk.f32.gmra.mrb[4].mxu0 %vm201_vm0, %v6418_v30 }
  0xbd   : > { %5005 = vmatprep.mubr.msk.f32.mxu1 %vm201_vm0, %v6406_v29  ;;  %5226 = vmatprep.mubr.msk.f32.mxu0 %vm201_vm0, %v6422_v17 }
  0xc0   : > { %5006 = vmatmul.mubr.msk.f32.gmra.mrb[8].mxu1 %vm201_vm0, %v6420_v31  ;;  %5227 = vmatmul.mubr.msk.f32.gmra.mrb[6].mxu0 %vm201_vm0, %v6434_v33 }
  0xc1   : > { %5008 = vmatprep.mubr.msk.f32.mxu1 %vm201_vm0, %v6424_v32  ;;  %5229 = vmatprep.mubr.msk.f32.mxu0 %vm201_vm0, %v6438_v35 }
  0xc4   : > { %5009 = vmatmul.mubr.msk.f32.gmra.mrb[10].mxu1 %vm201_vm0, %v6436_v34  ;;  %5230 = vmatmul.mubr.msk.f32.gmra.mrb[8].mxu0 %vm201_vm0, %v6450_v37 }
  0xc5   : > { %5011 = vmatprep.mubr.msk.f32.mxu1 %vm201_vm0, %v6440_v36  ;;  %5232 = vmatprep.mubr.msk.f32.mxu0 %vm201_vm0, %v6454_v39 }
  0xc8   : > { %5012 = vmatmul.mubr.msk.f32.gmra.mrb[12].mxu1 %vm201_vm0, %v6452_v38  ;;  %5233 = vmatmul.mubr.msk.f32.gmra.mrb[10].mxu0 %vm201_vm0, %v6466_v41 }
  0xc9   : > { %5014 = vmatprep.mubr.msk.f32.mxu1 %vm201_vm0, %v6456_v40  ;;  %5235 = vmatprep.mubr.msk.f32.mxu0 %vm201_vm0, %v6470_v43 }
  0xcc   : > { %5015 = vmatmul.mubr.msk.f32.gmra.mrb[14].mxu1 %vm201_vm0, %v6468_v42  ;;  %5236 = vmatmul.mubr.msk.f32.gmra.mrb[12].mxu0 %vm201_vm0, %v6482_v45 }
  0xcd   : > { %5017 = vmatprep.mubr.msk.f32.mxu1 %vm201_vm0, %v6472_v44  ;;  %5238 = vmatprep.mubr.msk.f32.mxu0 %vm201_vm0, %v6486_v47 }
  0xd0   : > { %5018 = vmatmul.mubr.msk.f32.gmra.mrb[16].mxu1 %vm201_vm0, %v6484_v46  ;;  %5239 = vmatmul.mubr.msk.f32.gmra.mrb[14].mxu0 %vm201_vm0, %v6498_v51 }
  0xd1   : > { %5020 = vmatprep.mubr.msk.f32.mxu1 %vm201_vm0, %v6488_v49  ;;  %5241 = vmatprep.mubr.msk.f32.mxu0 %vm201_vm0, %v6502_v1 }
  0xd4   : > { %5021 = vmatmul.mubr.msk.f32.gmra.mrb[18].mxu1 %vm201_vm0, %v6500_v63  ;;  %5242 = vmatmul.mubr.msk.f32.gmra.mrb[16].mxu0 %vm201_vm0, %v6514_v3 }
  0xd5   : > { %5023 = vmatprep.mubr.msk.f32.mxu1 %vm201_vm0, %v6504_v2  ;;  %5244 = vmatprep.mubr.msk.f32.mxu0 %vm201_vm0, %v6518_v8 }
  0xd8   : > { %5024 = vmatmul.mubr.msk.f32.gmra.mrb[20].mxu1 %vm201_vm0, %v6516_v7  ;;  %5245 = vmatmul.mubr.msk.f32.gmra.mrb[18].mxu0 %vm201_vm0, %v6530_v13 }
  0xd9   : > { %5026 = vmatprep.mubr.msk.f32.mxu1 %vm201_vm0, %v6520_v9  ;;  %5247 = vmatprep.mubr.msk.f32.mxu0 %vm201_vm0, %v6534_v16 }
  0xdc   : > { %5027 = vmatmul.mubr.msk.f32.gmra.mrb[22].mxu1 %vm201_vm0, %v6532_v15  ;;  %5248 = vmatmul.mubr.msk.f32.gmra.mrb[20].mxu0 %vm201_vm0, %v6546_v19 }
  0xdd   : > { %5029 = vmatprep.mubr.msk.f32.mxu1 %vm201_vm0, %v6536_v18  ;;  %5250 = vmatprep.mubr.msk.f32.mxu0 %vm201_vm0, %v6550_v0 }
  0xe0   : > { %5030 = vmatmul.mubr.msk.f32.gmra.mrb[24].mxu1 %vm201_vm0, %v6548_v4  ;;  %5251 = vmatmul.mubr.msk.f32.gmra.mrb[22].mxu0 %vm201_vm0, %v6562_v61 }
  0xe1   : > { %5032 = vmatprep.mubr.msk.f32.mxu1 %vm201_vm0, %v6552_v62  ;;  %5253 = vmatprep.mubr.msk.f32.mxu0 %vm201_vm0, %v6566_v59 }
  0xe4   : > { %5033 = vmatmul.mubr.msk.f32.gmra.mrb[26].mxu1 %vm201_vm0, %v6564_v60  ;;  %5254 = vmatmul.mubr.msk.f32.gmra.mrb[24].mxu0 %vm201_vm0, %v6578_v57 }
  0xe5   : > { %5035 = vmatprep.mubr.msk.f32.mxu1 %vm201_vm0, %v6568_v58  ;;  %5256 = vmatprep.mubr.msk.f32.mxu0 %vm201_vm0, %v7261_v53 }
  0xe8   : > { %5036 = vmatmul.mubr.msk.f32.gmra.mrb[28].mxu1 %vm201_vm0, %v7262_v6  ;;  %5257 = vmatmul.mubr.msk.f32.gmra.mrb[26].mxu0 %vm201_vm0, %v7263_v10  ;;  %v7267_v6 = vld [vmem:[#allocation22_spill] sm:$0xff] }
  0xe9   : > { %5038 = vmatprep.mubr.msk.f32.mxu1 %vm201_vm0, %v7264_v11  ;;  %5259 = vmatprep.mubr.msk.f32.mxu0 %vm201_vm0, %v6743_v55  ;;  %v4461_v11 = vld [vmem:[%s7203_s1 + $0x118] sm:$0xff] }
  0xec   : > { %5039 = vmatmul.mubr.msk.f32.gmra.mrb[30].mxu1 %vm201_vm0, %v7265_v50  ;;  %5260 = vmatmul.mubr.msk.f32.gmra.mrb[28].mxu0 %vm201_vm0, %v6753_v24  ;;  %v2976_v50 = vld [vmem:[#allocation2 + $0x49] sm:$0xff] }
  0xed   : > { %5049 = vmatprep.mubr.msk.f32.mxu1 %vm201_vm0, %v7266_v54  ;;  %5262 = vmatprep.mubr.msk.f32.mxu0 %vm201_vm0, %v2614_v25  ;;  %v2975_v25 = vld [vmem:[#allocation2 + $0x39] sm:$0xff]  ;;  %v5525_v54 = vpack.c.bf16 %v4461_v11, %v4460_v48  ;;  %v2979_v48 = vld [vmem:[#allocation2 + $0x69] sm:$0xff] }
  0xf0   : > { %5050 = vmatmul.mubr.msk.f32.vlgmr.msra.gmra.mrb[0].mxu1 %vm201_vm0, %v7267_v6  ;;  %5263 = vmatmul.mubr.msk.f32.gmra.mrb[30].mxu0 %vm201_vm0, %v2615_v5  ;;  %v2977_v6 = vld [vmem:[#allocation2 + $0x51] sm:$0xff]  ;;  %v2978_v5 = vld [vmem:[#allocation2 + $0x61] sm:$0xff] }
  0xf1   : > { %5052 = vmatprep.mubr.msk.f32.mxu1 %vm201_vm0, %v6355_v12  ;;  %5273 = vmatprep.mubr.msk.f32.mxu0 %vm201_vm0, %v2974_v56  ;;  %v2980_v56 = vld [vmem:[#allocation2 + $0x79] sm:$0xff]  ;;  %v2981_v12 = vld [vmem:[#allocation2 + $0x81] sm:$0xff] }
  0xf4   : > { %5053 = vmatmul.mubr.msk.f32.gmra.mrb[2].mxu1 %vm201_vm0, %v6378_v20  ;;  %5274 = vmatmul.mubr.msk.f32.vlgmr.msra.gmra.mrb[0].mxu0 %vm201_vm0, %v2975_v25  ;;  %v2982_v20 = vld [vmem:[#allocation2 + $0x91] sm:$0xff] }
  0xf5   : > { %5524 = vmatpush3.bf16.msra.mxu0 %v6644_v52  ;;  %5055 = vmatprep.mubr.msk.f32.mxu1 %vm201_vm0, %v6384_v22  ;;  %v2983_v22 = vld [vmem:[#allocation2 + $0x99] sm:$0xff]  ;;  %v3799_v52 = vld [vmem:[%s7204_s2 + $0x68] sm:$0xff] }
  0xf6   : > { %5276 = vmatprep.mubr.msk.f32.mxu0 %vm201_vm0, %v2976_v50  ;;  %5526 = vmatprep.subr.bf16.mxu0 %v5525_v54 }
  0xf8   : > { %5056 = vmatmul.mubr.msk.f32.gmra.mrb[4].mxu1 %vm201_vm0, %v6400_v26  ;;  %5277 = vmatmul.mubr.msk.f32.gmra.mrb[2].mxu0 %vm201_vm0, %v2977_v6  ;;  %v2984_v26 = vld [vmem:[#allocation2 + $0xa9] sm:$0xff] }
  0xf9   : > { %5058 = vmatprep.mubr.msk.f32.mxu1 %vm201_vm0, %v6404_v28  ;;  %5279 = vmatprep.mubr.msk.f32.mxu0 %vm201_vm0, %v2978_v5  ;;  %v2985_v28 = vld [vmem:[#allocation2 + $0xb1] sm:$0xff] }
  0xfa   : > { %5528 = vmatpush3.bf16.msra.mxu0 %v5525_v54 }
  0xfc   : > { %5059 = vmatmul.mubr.msk.f32.gmra.mrb[6].mxu1 %vm201_vm0, %v6418_v30  ;;  %5280 = vmatmul.mubr.msk.f32.gmra.mrb[4].mxu0 %vm201_vm0, %v2979_v48  ;;  %v2986_v30 = vld [vmem:[#allocation2 + $0xc1] sm:$0xff] }
  0xfd   : > { %5061 = vmatprep.mubr.msk.f32.mxu1 %vm201_vm0, %v6422_v17  ;;  %5282 = vmatprep.mubr.msk.f32.mxu0 %vm201_vm0, %v2980_v56  ;;  %v2987_v17 = vld [vmem:[#allocation2 + $0xc9] sm:$0xff] }
 0x100   : > { %5062 = vmatmul.mubr.msk.f32.gmra.mrb[8].mxu1 %vm201_vm0, %v6434_v33  ;;  %5283 = vmatmul.mubr.msk.f32.gmra.mrb[6].mxu0 %vm201_vm0, %v2981_v12  ;;  %v2988_v33 = vld [vmem:[#allocation2 + $0xd9] sm:$0xff] }
 0x101   : > { %5064 = vmatprep.mubr.msk.f32.mxu1 %vm201_vm0, %v6438_v35  ;;  %5285 = vmatprep.mubr.msk.f32.mxu0 %vm201_vm0, %v2982_v20  ;;  %v7268_v35 = vld [vmem:[#allocation6_spill] sm:$0xff] }
 0x104   : > { %5065 = vmatmul.mubr.msk.f32.gmra.mrb[10].mxu1 %vm201_vm0, %v6450_v37  ;;  %5286 = vmatmul.mubr.msk.f32.gmra.mrb[8].mxu0 %vm201_vm0, %v2983_v22  ;;  %v7269_v37 = vld [vmem:[#allocation7_spill] sm:$0xff] }
 0x105   : > { %5067 = vmatprep.mubr.msk.f32.mxu1 %vm201_vm0, %v6454_v39  ;;  %5288 = vmatprep.mubr.msk.f32.mxu0 %vm201_vm0, %v2984_v26  ;;  %v7270_v39 = vld [vmem:[#allocation8_spill] sm:$0xff] }
 0x108   : > { %5068 = vmatmul.mubr.msk.f32.gmra.mrb[12].mxu1 %vm201_vm0, %v6466_v41  ;;  %5289 = vmatmul.mubr.msk.f32.gmra.mrb[10].mxu0 %vm201_vm0, %v2985_v28  ;;  %v7271_v41 = vld [vmem:[#allocation9_spill] sm:$0xff] }
 0x109   : > { %5070 = vmatprep.mubr.msk.f32.mxu1 %vm201_vm0, %v6470_v43  ;;  %5291 = vmatprep.mubr.msk.f32.mxu0 %vm201_vm0, %v2986_v30  ;;  %v7272_v43 = vld [vmem:[#allocation10_spill] sm:$0xff] }
 0x10c   : > { %5071 = vmatmul.mubr.msk.f32.gmra.mrb[14].mxu1 %vm201_vm0, %v6482_v45  ;;  %5292 = vmatmul.mubr.msk.f32.gmra.mrb[12].mxu0 %vm201_vm0, %v2987_v17  ;;  %v7273_v45 = vld [vmem:[#allocation11_spill] sm:$0xff] }
 0x10d   : > { %5073 = vmatprep.mubr.msk.f32.mxu1 %vm201_vm0, %v6486_v47  ;;  %5294 = vmatprep.mubr.msk.f32.mxu0 %vm201_vm0, %v2988_v33  ;;  %v7274_v47 = vld [vmem:[#allocation12_spill] sm:$0xff] }
 0x110   : > { %5074 = vmatmul.mubr.msk.f32.gmra.mrb[16].mxu1 %vm201_vm0, %v6498_v51  ;;  %5295 = vmatmul.mubr.msk.f32.gmra.mrb[14].mxu0 %vm201_vm0, %v7268_v35  ;;  %v7275_v51 = vld [vmem:[#allocation13_spill] sm:$0xff] }
 0x111   : > { %5076 = vmatprep.mubr.msk.f32.mxu1 %vm201_vm0, %v6502_v1  ;;  %5297 = vmatprep.mubr.msk.f32.mxu0 %vm201_vm0, %v7269_v37  ;;  %v7276_v1 = vld [vmem:[#allocation14_spill] sm:$0xff] }
 0x114   : > { %5077 = vmatmul.mubr.msk.f32.gmra.mrb[18].mxu1 %vm201_vm0, %v6514_v3  ;;  %5298 = vmatmul.mubr.msk.f32.gmra.mrb[16].mxu0 %vm201_vm0, %v7270_v39  ;;  %v7277_v3 = vld [vmem:[#allocation15_spill] sm:$0xff] }
 0x115   : > { %5079 = vmatprep.mubr.msk.f32.mxu1 %vm201_vm0, %v6518_v8  ;;  %5300 = vmatprep.mubr.msk.f32.mxu0 %vm201_vm0, %v7271_v41  ;;  %v7278_v8 = vld [vmem:[#allocation16_spill] sm:$0xff] }
 0x118   : > { %5080 = vmatmul.mubr.msk.f32.gmra.mrb[20].mxu1 %vm201_vm0, %v6530_v13  ;;  %5301 = vmatmul.mubr.msk.f32.gmra.mrb[18].mxu0 %vm201_vm0, %v7272_v43  ;;  %v7282_v13 = vld [vmem:[#allocation20_spill] sm:$0xff] }
 0x119   : > { %5082 = vmatprep.mubr.msk.f32.mxu1 %vm201_vm0, %v6534_v16  ;;  %5303 = vmatprep.mubr.msk.f32.mxu0 %vm201_vm0, %v7273_v45  ;;  %v3005_v16 = vld [vmem:[#allocation2 + $0x1a1] sm:$0xff] }
 0x11c   : > { %5083 = vmatmul.mubr.msk.f32.gmra.mrb[22].mxu1 %vm201_vm0, %v6546_v19  ;;  %5304 = vmatmul.mubr.msk.f32.gmra.mrb[20].mxu0 %vm201_vm0, %v7274_v47  ;;  %v3798_v19 = vld [vmem:[%s7204_s2 + $0x60] sm:$0xff] }
 0x11d   : > { %5085 = vmatprep.mubr.msk.f32.mxu1 %vm201_vm0, %v6550_v0  ;;  %5306 = vmatprep.mubr.msk.f32.mxu0 %vm201_vm0, %v7275_v51  ;;  %v7279_v0 = vld [vmem:[#allocation17_spill] sm:$0xff] }
 0x120   : > { %5086 = vmatmul.mubr.msk.f32.gmra.mrb[24].mxu1 %vm201_vm0, %v6562_v61  ;;  %5307 = vmatmul.mubr.msk.f32.gmra.mrb[22].mxu0 %vm201_vm0, %v7276_v1  ;;  %v7280_v61 = vld [vmem:[#allocation18_spill] sm:$0xff] }
 0x121   : > { %5088 = vmatprep.mubr.msk.f32.mxu1 %vm201_vm0, %v6566_v59  ;;  %5309 = vmatprep.mubr.msk.f32.mxu0 %vm201_vm0, %v7277_v3  ;;  %v7281_v59 = vld [vmem:[#allocation19_spill] sm:$0xff] }
 0x124   : > { %5089 = vmatmul.mubr.msk.f32.gmra.mrb[26].mxu1 %vm201_vm0, %v6578_v57  ;;  %5310 = vmatmul.mubr.msk.f32.gmra.mrb[24].mxu0 %vm201_vm0, %v7278_v8  ;;  %v3004_v57 = vld [vmem:[#allocation2 + $0x199] sm:$0xff] }
 0x125   : > { %5091 = vmatprep.mubr.msk.f32.mxu1 %vm201_vm0, %v7261_v53  ;;  %5312 = vmatprep.mubr.msk.f32.mxu0 %vm201_vm0, %v7279_v0  ;;  %v5553_v53 = vpack.c.bf16 %v3799_v52, %v3798_v19 }
 0x128   : > { %5092 = vmatmul.mubr.msk.f32.gmra.mrb[28].mxu1 %vm201_vm0, %v7263_v10  ;;  %5313 = vmatmul.mubr.msk.f32.gmra.mrb[26].mxu0 %vm201_vm0, %v7280_v61  ;;  %v3801_v10 = vld [vmem:[%s7204_s2 + $0x78] sm:$0xff] }
 0x129   : > { %5094 = vmatprep.mubr.msk.f32.mxu1 %vm201_vm0, %v6743_v55  ;;  %5315 = vmatprep.mubr.msk.f32.mxu0 %vm201_vm0, %v7281_v59  ;;  %v3800_v55 = vld [vmem:[%s7204_s2 + $0x70] sm:$0xff] }
 0x12a   : > { %v5557_v11 = vpack.c.bf16 %v3801_v10, %v3800_v55 }
 0x12c   : > { %5095 = vmatmul.mubr.msk.f32.gmra.mrb[30].mxu1 %vm201_vm0, %v6753_v24  ;;  %5316 = vmatmul.mubr.msk.f32.gmra.mrb[28].mxu0 %vm201_vm0, %v7282_v13 }
 0x12d   : > { %5318 = vmatprep.mubr.msk.f32.mxu0 %vm201_vm0, %v3004_v57 }
 0x130   : > { %5319 = vmatmul.mubr.msk.f32.gmra.mrb[30].mxu0 %vm201_vm0, %v3005_v16 }
 0x131   : > { %5329 = vmatprep.mubr.msk.f32.mxu0 %vm201_vm0, %v6357_v14  ;;  %v3786_v14 = vld [vmem:[%s7204_s2] sm:$0xff] }
 0x134   : > { %5330 = vmatmul.mubr.msk.f32.vlgmr.msra.gmra.mrb[0].mxu0 %vm201_vm0, %v6380_v21  ;;  %v3787_v21 = vld [vmem:[%s7204_s2 + $0x8] sm:$0xff] }
 0x135   : > { %5332 = vmatprep.mubr.msk.f32.mxu0 %vm201_vm0, %v6386_v23  ;;  %v5529_v23 = vpack.c.bf16 %v3787_v21, %v3786_v14 }
 0x137   : > { %5530 = vmatprep.subr.bf16.mxu1 %v5529_v23 }
 0x138   : > { %5333 = vmatmul.mubr.msk.f32.gmra.mrb[2].mxu0 %vm201_vm0, %v6402_v27  ;;  %5532 = vmatpush3.bf16.msra.mxu1 %v5529_v23  ;;  %v3788_v27 = vld [vmem:[%s7204_s2 + $0x10] sm:$0xff] }
 0x139   : > { %5335 = vmatprep.mubr.msk.f32.mxu0 %vm201_vm0, %v6406_v29  ;;  %v3789_v29 = vld [vmem:[%s7204_s2 + $0x18] sm:$0xff] }
 0x13c   : > { %5336 = vmatmul.mubr.msk.f32.gmra.mrb[4].mxu0 %vm201_vm0, %v6420_v31  ;;  %v5533_v31 = vpack.c.bf16 %v3789_v29, %v3788_v27 }
 0x13d   : > { %5338 = vmatprep.mubr.msk.f32.mxu0 %vm201_vm0, %v6424_v32  ;;  %v3790_v32 = vld [vmem:[%s7204_s2 + $0x20] sm:$0xff] }
 0x13e   : > { %5534 = vmatprep.subr.bf16.mxu1 %v5533_v31 }
 0x13f   : > { %5536 = vmatpush3.bf16.msra.mxu1 %v5533_v31 }
 0x140   : > { %5339 = vmatmul.mubr.msk.f32.gmra.mrb[6].mxu0 %vm201_vm0, %v6436_v34  ;;  %v3791_v34 = vld [vmem:[%s7204_s2 + $0x28] sm:$0xff] }
 0x141   : > { %5341 = vmatprep.mubr.msk.f32.mxu0 %vm201_vm0, %v6440_v36  ;;  %v5537_v36 = vpack.c.bf16 %v3791_v34, %v3790_v32 }
 0x143   : > { %5538 = vmatprep.subr.bf16.mxu1 %v5537_v36 }
 0x144   : > { %5342 = vmatmul.mubr.msk.f32.gmra.mrb[8].mxu0 %vm201_vm0, %v6452_v38  ;;  %5540 = vmatpush3.bf16.msra.mxu1 %v5537_v36  ;;  %v3792_v38 = vld [vmem:[%s7204_s2 + $0x30] sm:$0xff] }
 0x145   : > { %5344 = vmatprep.mubr.msk.f32.mxu0 %vm201_vm0, %v6456_v40  ;;  %v7284_v40 = vld [vmem:[#allocation25_spill] sm:$0xff] }
 0x148   : > { %5345 = vmatmul.mubr.msk.f32.gmra.mrb[10].mxu0 %vm201_vm0, %v6468_v42 }
 0x149   : > { %5347 = vmatprep.mubr.msk.f32.mxu0 %vm201_vm0, %v6472_v44  ;;  %v3394_v44 = vld [vmem:[#allocation2 + $0x19a] sm:$0xff] }
 0x14c   : > { %5348 = vmatmul.mubr.msk.f32.gmra.mrb[12].mxu0 %vm201_vm0, %v6484_v46  ;;  %v7287_v46 = vld [vmem:[#allocation29_spill] sm:$0xff] }
 0x14d   : > { %5350 = vmatprep.mubr.msk.f32.mxu0 %vm201_vm0, %v6488_v49  ;;  %v3794_v49 = vld [vmem:[%s7204_s2 + $0x40] sm:$0xff] }
 0x150   : > { %5351 = vmatmul.mubr.msk.f32.gmra.mrb[14].mxu0 %vm201_vm0, %v6500_v63  ;;  %v3795_v63 = vld [vmem:[%s7204_s2 + $0x48] sm:$0xff] }
 0x151   : > { %5353 = vmatprep.mubr.msk.f32.mxu0 %vm201_vm0, %v6504_v2  ;;  %v3395_v2 = vld [vmem:[#allocation2 + $0x1a2] sm:$0xff] }
 0x154   : > { %5354 = vmatmul.mubr.msk.f32.gmra.mrb[16].mxu0 %vm201_vm0, %v6516_v7  ;;  %v5545_v7 = vpack.c.bf16 %v3795_v63, %v3794_v49 }
 0x155   : > { %5356 = vmatprep.mubr.msk.f32.mxu0 %vm201_vm0, %v6520_v9  ;;  %v3796_v9 = vld [vmem:[%s7204_s2 + $0x50] sm:$0xff] }
 0x158   : > { %5357 = vmatmul.mubr.msk.f32.gmra.mrb[18].mxu0 %vm201_vm0, %v6532_v15  ;;  %v3797_v15 = vld [vmem:[%s7204_s2 + $0x58] sm:$0xff] }
 0x159   : > { %5359 = vmatprep.mubr.msk.f32.mxu0 %vm201_vm0, %v6536_v18  ;;  %v5549_v18 = vpack.c.bf16 %v3797_v15, %v3796_v9 }
 0x15c   : > { %5360 = vmatmul.mubr.msk.f32.gmra.mrb[20].mxu0 %vm201_vm0, %v6548_v4  ;;  %v7283_v4 = vld [vmem:[#allocation23_spill] sm:$0xff] }
 0x15d   : > { %5362 = vmatprep.mubr.msk.f32.mxu0 %vm201_vm0, %v6552_v62  ;;  %v3793_v62 = vld [vmem:[%s7204_s2 + $0x38] sm:$0xff] }
 0x15e   : > { %v5541_v42 = vpack.c.bf16 %v3793_v62, %v3792_v38 }
 0x160   : > { %5363 = vmatmul.mubr.msk.f32.gmra.mrb[22].mxu0 %vm201_vm0, %v6564_v60  ;;  %5542 = vmatprep.subr.bf16.mxu1 %v5541_v42  ;;  %v7285_v60 = vld [vmem:[#allocation27_spill] sm:$0xff] }
 0x161   : > { %5365 = vmatprep.mubr.msk.f32.mxu0 %vm201_vm0, %v6568_v58  ;;  %5544 = vmatpush3.bf16.msra.mxu1 %v5541_v42  ;;  %v7286_v58 = vld [vmem:[#allocation28_spill] sm:$0xff] }
 0x162   : > { %5546 = vmatprep.subr.bf16.mxu1 %v5545_v7 }
 0x164   : > { %5366 = vmatmul.mubr.msk.f32.gmra.mrb[24].mxu0 %vm201_vm0, %v7283_v4 }
 0x165   : > { %5368 = vmatprep.mubr.msk.f32.mxu0 %vm201_vm0, %v7284_v40  ;;  %5548 = vmatpush3.bf16.msra.mxu1 %v5545_v7 }
 0x166   : > { %5550 = vmatprep.subr.bf16.mxu1 %v5549_v18 }
 0x168   : > { %5369 = vmatmul.mubr.msk.f32.gmra.mrb[26].mxu0 %vm201_vm0, %v7285_v60 }
 0x169   : > { %5371 = vmatprep.mubr.msk.f32.mxu0 %vm201_vm0, %v7286_v58  ;;  %5552 = vmatpush3.bf16.msra.mxu1 %v5549_v18 }
 0x16a   : > { %5554 = vmatprep.subr.bf16.mxu1 %v5553_v53 }
 0x16c   : > { %5372 = vmatmul.mubr.msk.f32.gmra.mrb[28].mxu0 %vm201_vm0, %v7287_v46 }
 0x16d   : > { %5374 = vmatprep.mubr.msk.f32.mxu0 %vm201_vm0, %v3394_v44  ;;  %5556 = vmatpush3.bf16.msra.mxu1 %v5553_v53 }
 0x16e   : > { %5558 = vmatprep.subr.bf16.mxu1 %v5557_v11 }
 0x170   : > { %5375 = vmatmul.mubr.msk.f32.gmra.mrb[30].mxu0 %vm201_vm0, %v3395_v2 }
 0x171   : > { %5560 = vmatpush3.bf16.msra.mxu1 %v5557_v11 }
 0x1c3   : > { %v5051_v24 = vpop.f32.mrb[0].mxu1 }
 0x1c4   : > { %v1612_v50 = vpop.f32.mrb[1].mxu1 }
 0x1c7   : > { %v5054_v25 = vpop.f32.mrb[2].mxu1 }
 0x1c8   : > { %v1622_v54 = vpop.f32.mrb[3].mxu1 }
 0x1cb   : > { %v5057_v6 = vpop.f32.mrb[4].mxu1 }
 0x1cc   : > { %v1632_v5 = vpop.f32.mrb[5].mxu1 }
 0x1cf   : > { %v5060_v48 = vpop.f32.mrb[6].mxu1 }
 0x1d0   : > { %v1642_v56 = vpop.f32.mrb[7].mxu1 }
 0x1d3   : > { %v5063_v12 = vpop.f32.mrb[8].mxu1 }
 0x1d4   : > { %v1652_v20 = vpop.f32.mrb[9].mxu1 }
 0x1d7   : > { %v5066_v22 = vpop.f32.mrb[10].mxu1 }
 0x1d8   : > { %v1662_v26 = vpop.f32.mrb[11].mxu1 }
 0x1db   : > { %v6989_v28 = vpop.f32.mrb[12].mxu1 }
 0x1dc   : > { %v6991_v30 = vpop.f32.mrb[13].mxu1 }
 0x1df   : > { %v6993_v17 = vpop.f32.mrb[14].mxu1 }
 0x1e0   : > { %v6995_v33 = vpop.f32.mrb[15].mxu1 }
 0x1e3   : > { %v6997_v35 = vpop.f32.mrb[16].mxu1 }
 0x1e4   : > { %v6999_v37 = vpop.f32.mrb[17].mxu1 }
 0x1e7   : > { %v7001_v39 = vpop.f32.mrb[18].mxu1 }
 0x1e8   : > { %v7003_v41 = vpop.f32.mrb[19].mxu1 }
 0x1eb   : > { %v7005_v43 = vpop.f32.mrb[20].mxu1 }
 0x1ec   : > { %v7007_v45 = vpop.f32.mrb[21].mxu1 }
 0x1ef   : > { %v7009_v47 = vpop.f32.mrb[22].mxu1 }
 0x1f0   : > { %v7011_v51 = vpop.f32.mrb[23].mxu1 }
 0x1f3   : > { %v7013_v1 = vpop.f32.mrb[24].mxu1 }
 0x1f4   : > { %v7015_v3 = vpop.f32.mrb[25].mxu1 }
 0x1f7   : > { %v7017_v8 = vpop.f32.mrb[26].mxu1 }
 0x1f8   : > { %v7019_v0 = vpop.f32.mrb[27].mxu1 }
 0x1fb   : > { %v7021_v61 = vpop.f32.mrb[28].mxu1 }
 0x1fc   : > { %v7023_v59 = vpop.f32.mrb[29].mxu1 }
 0x1ff   : > { %v7025_v57 = vpop.f32.mrb[30].mxu1 }
 0x200   : > { %v7027_v13 = vpop.f32.mrb[31].mxu1 }
 0x207   : > { %v5331_v16 = vpop.f32.mrb[0].mxu0 }
 0x208   : > { %v5561_v14 = vadd.f32 %v5331_v16, %v5051_v24  ;;  %v3563_v21 = vpop.f32.mrb[1].mxu0 }
 0x209   : > { %v5562_v23 = vadd.f32 %v3563_v21, %v1612_v50 }
 0x20a   : > { %v3755_v31 = vmax.f32 %v5561_v14, 0.0 }
 0x20b   : > { %v3754_v27 = vmax.f32 %v5562_v23, 0.0  ;;  %v5334_v29 = vpop.f32.mrb[2].mxu0 }
 0x20c   : > { %v5563_v32 = vadd.f32 %v5334_v29, %v5054_v25  ;;  %v3573_v34 = vpop.f32.mrb[3].mxu0 }
 0x20d   : > { %v5564_v36 = vadd.f32 %v3573_v34, %v1622_v54  ;;  %5409 = vmatprep.mubr.f32.mxu1 %v3754_v27 }
 0x20e   : > { %5410 = vmatmul.mubr.f32.vlgmr.msra.gmra.mrb[32].mxu1 %v3755_v31  ;;  %v3757_v62 = vmax.f32 %v5563_v32, 0.0 }
 0x20f   : > { %v3756_v4 = vmax.f32 %v5564_v36, 0.0  ;;  %v5337_v38 = vpop.f32.mrb[4].mxu0 }
 0x210   : > { %v5565_v40 = vadd.f32 %v5337_v38, %v5057_v6  ;;  %v3583_v42 = vpop.f32.mrb[5].mxu0 }
 0x211   : > { %v5566_v60 = vadd.f32 %v3583_v42, %v1632_v5  ;;  %5412 = vmatprep.mubr.f32.mxu1 %v3756_v4 }
 0x212   : > { %5413 = vmatmul.mubr.f32.gmra.mrb[34].mxu1 %v3757_v62  ;;  %v3759_v46 = vmax.f32 %v5565_v40, 0.0 }
 0x213   : > { %v3758_v58 = vmax.f32 %v5566_v60, 0.0  ;;  %v5340_v44 = vpop.f32.mrb[6].mxu0 }
 0x214   : > { %v5567_v49 = vadd.f32 %v5340_v44, %v5060_v48  ;;  %v3593_v63 = vpop.f32.mrb[7].mxu0 }
 0x215   : > { %v5568_v2 = vadd.f32 %v3593_v63, %v1642_v56  ;;  %5415 = vmatprep.mubr.f32.mxu1 %v3758_v58 }
 0x216   : > { %5416 = vmatmul.mubr.f32.gmra.mrb[36].mxu1 %v3759_v46  ;;  %v3761_v15 = vmax.f32 %v5567_v49, 0.0 }
 0x217   : > { %v3760_v7 = vmax.f32 %v5568_v2, 0.0  ;;  %v5343_v9 = vpop.f32.mrb[8].mxu0 }
 0x218   : > { %v5569_v18 = vadd.f32 %v5343_v9, %v5063_v12  ;;  %v3603_v19 = vpop.f32.mrb[9].mxu0 }
 0x219   : > { %v5570_v52 = vadd.f32 %v3603_v19, %v1652_v20  ;;  %5418 = vmatprep.mubr.f32.mxu1 %v3760_v7 }
 0x21a   : > { %5419 = vmatmul.mubr.f32.gmra.mrb[38].mxu1 %v3761_v15  ;;  %v3763_v10 = vmax.f32 %v5569_v18, 0.0 }
 0x21b   : > { %v3762_v53 = vmax.f32 %v5570_v52, 0.0  ;;  %v5346_v55 = vpop.f32.mrb[10].mxu0 }
 0x21c   : > { %v5571_v11 = vadd.f32 %v5346_v55, %v5066_v22  ;;  %v3613_v24 = vpop.f32.mrb[11].mxu0 }
 0x21d   : > { %v5572_v50 = vadd.f32 %v3613_v24, %v1662_v26  ;;  %5421 = vmatprep.mubr.f32.mxu1 %v3762_v53 }
 0x21e   : > { %5422 = vmatmul.mubr.f32.gmra.mrb[40].mxu1 %v3763_v10  ;;  %v3765_v6 = vmax.f32 %v5571_v11, 0.0 }
 0x21f   : > { %v3764_v25 = vmax.f32 %v5572_v50, 0.0  ;;  %v5349_v54 = vpop.f32.mrb[12].mxu0 }
 0x220   : > { %v5573_v5 = vadd.f32 %v5349_v54, %v6989_v28  ;;  %v3623_v48 = vpop.f32.mrb[13].mxu0  ;;  %v5859_v54 = vld [vmem:[%s6106_s7 + $0x8] sm:$0xff] }
 0x221   : > { %v5574_v56 = vadd.f32 %v3623_v48, %v6991_v30  ;;  %5424 = vmatprep.mubr.f32.mxu1 %v3764_v25 }
 0x222   : > { %5425 = vmatmul.mubr.f32.gmra.mrb[42].mxu1 %v3765_v6  ;;  %v3767_v16 = vmax.f32 %v5573_v5, 0.0 }
 0x223   : > { %v3766_v12 = vmax.f32 %v5574_v56, 0.0  ;;  %v5352_v20 = vpop.f32.mrb[14].mxu0  ;;  %v5861_v56 = vld [vmem:[%s6106_s7 + $0x18] sm:$0xff] }
 0x224   : > { %v5575_v14 = vadd.f32 %v5352_v20, %v6993_v17  ;;  %v3633_v22 = vpop.f32.mrb[15].mxu0 }
 0x225   : > { %v5576_v26 = vadd.f32 %v3633_v22, %v6995_v33  ;;  %5427 = vmatprep.mubr.f32.mxu1 %v3766_v12 }
 0x226   : > { %5428 = vmatmul.mubr.f32.gmra.mrb[44].mxu1 %v3767_v16  ;;  %v3769_v27 = vmax.f32 %v5575_v14, 0.0  ;;  %v5862_v16 = vld [vmem:[%s6106_s7 + $0x10] sm:$0xff] }
 0x227   : > { %v3768_v21 = vmax.f32 %v5576_v26, 0.0  ;;  %v5355_v23 = vpop.f32.mrb[16].mxu0  ;;  %v5863_v26 = vld [vmem:[%s6106_s7 + $0x28] sm:$0xff] }
 0x228   : > { %v5577_v28 = vadd.f32 %v5355_v23, %v6997_v35  ;;  %v3643_v29 = vpop.f32.mrb[17].mxu0 }
 0x229   : > { %v5578_v30 = vadd.f32 %v3643_v29, %v6999_v37  ;;  %5430 = vmatprep.mubr.f32.mxu1 %v3768_v21 }
 0x22a   : > { %5431 = vmatmul.mubr.f32.gmra.mrb[46].mxu1 %v3769_v27  ;;  %v3771_v34 = vmax.f32 %v5577_v28, 0.0  ;;  %v5864_v27 = vld [vmem:[%s6106_s7 + $0x20] sm:$0xff] }
 0x22b   : > { %v3770_v31 = vmax.f32 %v5578_v30, 0.0  ;;  %v5358_v32 = vpop.f32.mrb[18].mxu0  ;;  %v5865_v30 = vld [vmem:[%s6106_s7 + $0x38] sm:$0xff] }
 0x22c   : > { %v5579_v17 = vadd.f32 %v5358_v32, %v7001_v39  ;;  %v3653_v36 = vpop.f32.mrb[19].mxu0 }
 0x22d   : > { %v5580_v33 = vadd.f32 %v3653_v36, %v7003_v41  ;;  %5433 = vmatprep.mubr.f32.mxu1 %v3770_v31 }
 0x22e   : > { %5434 = vmatmul.mubr.f32.gmra.mrb[48].mxu1 %v3771_v34  ;;  %v3773_v62 = vmax.f32 %v5579_v17, 0.0  ;;  %v5866_v34 = vld [vmem:[%s6106_s7 + $0x30] sm:$0xff] }
 0x22f   : > { %v3772_v4 = vmax.f32 %v5580_v33, 0.0  ;;  %v5361_v38 = vpop.f32.mrb[20].mxu0  ;;  %v5867_v33 = vld [vmem:[%s6106_s7 + $0x48] sm:$0xff] }
 0x230   : > { %v5581_v35 = vadd.f32 %v5361_v38, %v7005_v43  ;;  %v3663_v40 = vpop.f32.mrb[21].mxu0 }
 0x231   : > { %v5582_v37 = vadd.f32 %v3663_v40, %v7007_v45  ;;  %5436 = vmatprep.mubr.f32.mxu1 %v3772_v4 }
 0x232   : > { %5437 = vmatmul.mubr.f32.gmra.mrb[50].mxu1 %v3773_v62  ;;  %v3775_v58 = vmax.f32 %v5581_v35, 0.0  ;;  %v5868_v62 = vld [vmem:[%s6106_s7 + $0x40] sm:$0xff] }
 0x233   : > { %v3774_v42 = vmax.f32 %v5582_v37, 0.0  ;;  %v5364_v60 = vpop.f32.mrb[22].mxu0  ;;  %v5869_v37 = vld [vmem:[%s6106_s7 + $0x58] sm:$0xff] }
 0x234   : > { %v5583_v39 = vadd.f32 %v5364_v60, %v7009_v47  ;;  %v3673_v44 = vpop.f32.mrb[23].mxu0 }
 0x235   : > { %v5584_v41 = vadd.f32 %v3673_v44, %v7011_v51  ;;  %5439 = vmatprep.mubr.f32.mxu1 %v3774_v42 }
 0x236   : > { %5440 = vmatmul.mubr.f32.gmra.mrb[52].mxu1 %v3775_v58  ;;  %v3777_v63 = vmax.f32 %v5583_v39, 0.0  ;;  %v5870_v58 = vld [vmem:[%s6106_s7 + $0x50] sm:$0xff] }
 0x237   : > { %v3776_v46 = vmax.f32 %v5584_v41, 0.0  ;;  %v5367_v49 = vpop.f32.mrb[24].mxu0  ;;  %v5871_v41 = vld [vmem:[%s6106_s7 + $0x68] sm:$0xff] }
 0x238   : > { %v5585_v43 = vadd.f32 %v5367_v49, %v7013_v1  ;;  %v3683_v2 = vpop.f32.mrb[25].mxu0 }
 0x239   : > { %v5586_v45 = vadd.f32 %v3683_v2, %v7015_v3  ;;  %5442 = vmatprep.mubr.f32.mxu1 %v3776_v46 }
 0x23a   : > { %5443 = vmatmul.mubr.f32.gmra.mrb[54].mxu1 %v3777_v63  ;;  %v3779_v15 = vmax.f32 %v5585_v43, 0.0  ;;  %v5872_v63 = vld [vmem:[%s6106_s7 + $0x60] sm:$0xff] }
 0x23b   : > { %v3778_v7 = vmax.f32 %v5586_v45, 0.0  ;;  %v5370_v9 = vpop.f32.mrb[26].mxu0  ;;  %v5873_v45 = vld [vmem:[%s6106_s7 + $0x78] sm:$0xff] }
 0x23c   : > { %v5587_v47 = vadd.f32 %v5370_v9, %v7017_v8  ;;  %v3693_v18 = vpop.f32.mrb[27].mxu0 }
 0x23d   : > { %v5588_v51 = vadd.f32 %v3693_v18, %v7019_v0  ;;  %5445 = vmatprep.mubr.f32.mxu1 %v3778_v7 }
 0x23e   : > { %5446 = vmatmul.mubr.f32.gmra.mrb[56].mxu1 %v3779_v15  ;;  %v3781_v53 = vmax.f32 %v5587_v47, 0.0  ;;  %v5874_v15 = vld [vmem:[%s6106_s7 + $0x70] sm:$0xff] }
 0x23f   : > { %v3780_v19 = vmax.f32 %v5588_v51, 0.0  ;;  %v5373_v52 = vpop.f32.mrb[28].mxu0  ;;  %v5875_v51 = vld [vmem:[%s6106_s7 + $0x88] sm:$0xff] }
 0x240   : > { %v5589_v1 = vadd.f32 %v5373_v52, %v7021_v61  ;;  %v3703_v55 = vpop.f32.mrb[29].mxu0 }
 0x241   : > { %v5590_v3 = vadd.f32 %v3703_v55, %v7023_v59  ;;  %5448 = vmatprep.mubr.f32.mxu1 %v3780_v19 }
 0x242   : > { %5449 = vmatmul.mubr.f32.gmra.mrb[58].mxu1 %v3781_v53  ;;  %v3783_v11 = vmax.f32 %v5589_v1, 0.0  ;;  %v5876_v53 = vld [vmem:[%s6106_s7 + $0x80] sm:$0xff] }
 0x243   : > { %v3782_v10 = vmax.f32 %v5590_v3, 0.0  ;;  %v5376_v8 = vpop.f32.mrb[30].mxu0  ;;  %v5877_v3 = vld [vmem:[%s6106_s7 + $0x98] sm:$0xff] }
 0x244   : > { %v5591_v0 = vadd.f32 %v5376_v8, %v7025_v57  ;;  %v3713_v24 = vpop.f32.mrb[31].mxu0  ;;  %v5860_v57 = vld [vmem:[%s6106_s7] sm:$0xff] }
 0x245   : > { %v5592_v50 = vadd.f32 %v3713_v24, %v7027_v13  ;;  %5451 = vmatprep.mubr.f32.mxu1 %v3782_v10 }
 0x246   : > { %5452 = vmatmul.mubr.f32.gmra.mrb[60].mxu1 %v3783_v11  ;;  %v3785_v25 = vmax.f32 %v5591_v0, 0.0  ;;  %v5878_v11 = vld [vmem:[%s6106_s7 + $0x90] sm:$0xff] }
 0x247   : > { %v3784_v61 = vmax.f32 %v5592_v50, 0.0  ;;  %v5879_v50 = vld [vmem:[%s6106_s7 + $0xa8] sm:$0xff] }
 0x249   : > { %5454 = vmatprep.mubr.f32.mxu1 %v3784_v61 }
 0x24a   : > { %5455 = vmatmul.mubr.f32.gmra.mrb[62].mxu1 %v3785_v25 }
 0x2e1   : > { %v5411_v59 = vpop.f32.mrb[32].mxu1 }
 0x2e2   : > { %v4028_v6 = vadd.f32 %v5859_v54, %v5411_v59  ;;  %v3868_v5 = vpop.f32.mrb[33].mxu1  ;;  %v5880_v59 = vld [vmem:[%s6106_s7 + $0xa0] sm:$0xff] }
 0x2e3   : > { %v4027_v48 = vadd.f32 %v5860_v57, %v3868_v5  ;;  %v5881_v5 = vld [vmem:[%s6106_s7 + $0xb8] sm:$0xff] }
 0x2e4   : > { %4060 = vst.msk [vmem:[%s7054_s4 + $0x8] sm:$0xff] %vm201_vm0, %v4028_v6 }
 0x2e5   : > { %4059 = vst.msk [vmem:[%s7054_s4] sm:$0xff] %vm201_vm0, %v4027_v48  ;;  %v5414_v13 = vpop.f32.mrb[34].mxu1 }
 0x2e6   : > { %v4030_v12 = vadd.f32 %v5861_v56, %v5414_v13  ;;  %v3878_v20 = vpop.f32.mrb[35].mxu1  ;;  %v5882_v13 = vld [vmem:[%s6106_s7 + $0xb0] sm:$0xff] }
 0x2e7   : > { %v4029_v14 = vadd.f32 %v5862_v16, %v3878_v20  ;;  %v5883_v20 = vld [vmem:[%s6106_s7 + $0xc8] sm:$0xff] }
 0x2e8   : > { %4062 = vst.msk [vmem:[%s7054_s4 + $0x18] sm:$0xff] %vm201_vm0, %v4030_v12 }
 0x2e9   : > { %4061 = vst.msk [vmem:[%s7054_s4 + $0x10] sm:$0xff] %vm201_vm0, %v4029_v14  ;;  %v5417_v22 = vpop.f32.mrb[36].mxu1 }
 0x2ea   : > { %v4032_v21 = vadd.f32 %v5863_v26, %v5417_v22  ;;  %v3888_v23 = vpop.f32.mrb[37].mxu1  ;;  %v5884_v22 = vld [vmem:[%s6106_s7 + $0xc0] sm:$0xff] }
 0x2eb   : > { %v4031_v28 = vadd.f32 %v5864_v27, %v3888_v23  ;;  %v5885_v23 = vld [vmem:[%s6106_s7 + $0xd8] sm:$0xff] }
 0x2ec   : > { %4064 = vst.msk [vmem:[%s7054_s4 + $0x28] sm:$0xff] %vm201_vm0, %v4032_v21 }
 0x2ed   : > { %4063 = vst.msk [vmem:[%s7054_s4 + $0x20] sm:$0xff] %vm201_vm0, %v4031_v28  ;;  %v5420_v29 = vpop.f32.mrb[38].mxu1 }
 0x2ee   : > { %v4034_v31 = vadd.f32 %v5865_v30, %v5420_v29  ;;  %v3898_v32 = vpop.f32.mrb[39].mxu1  ;;  %v5886_v29 = vld [vmem:[%s6106_s7 + $0xd0] sm:$0xff] }
 0x2ef   : > { %v4033_v17 = vadd.f32 %v5866_v34, %v3898_v32  ;;  %v5887_v32 = vld [vmem:[%s6106_s7 + $0xe8] sm:$0xff] }
 0x2f0   : > { %4066 = vst.msk [vmem:[%s7054_s4 + $0x38] sm:$0xff] %vm201_vm0, %v4034_v31 }
 0x2f1   : > { %4065 = vst.msk [vmem:[%s7054_s4 + $0x30] sm:$0xff] %vm201_vm0, %v4033_v17  ;;  %v5423_v36 = vpop.f32.mrb[40].mxu1 }
 0x2f2   : > { %v4036_v4 = vadd.f32 %v5867_v33, %v5423_v36  ;;  %v3908_v38 = vpop.f32.mrb[41].mxu1  ;;  %v5888_v36 = vld [vmem:[%s6106_s7 + $0xe0] sm:$0xff] }
 0x2f3   : > { %v4035_v35 = vadd.f32 %v5868_v62, %v3908_v38  ;;  %v5889_v38 = vld [vmem:[%s6106_s7 + $0xf8] sm:$0xff] }
 0x2f4   : > { %4068 = vst.msk [vmem:[%s7054_s4 + $0x48] sm:$0xff] %vm201_vm0, %v4036_v4 }
 0x2f5   : > { %4067 = vst.msk [vmem:[%s7054_s4 + $0x40] sm:$0xff] %vm201_vm0, %v4035_v35  ;;  %v5426_v40 = vpop.f32.mrb[42].mxu1 }
 0x2f6   : > { %v4038_v42 = vadd.f32 %v5869_v37, %v5426_v40  ;;  %v3918_v60 = vpop.f32.mrb[43].mxu1  ;;  %v5890_v40 = vld [vmem:[%s6106_s7 + $0xf0] sm:$0xff] }
 0x2f7   : > { %v4037_v39 = vadd.f32 %v5870_v58, %v3918_v60 }
 0x2f8   : > { %4070 = vst.msk [vmem:[%s7054_s4 + $0x58] sm:$0xff] %vm201_vm0, %v4038_v42 }
 0x2f9   : > { %4069 = vst.msk [vmem:[%s7054_s4 + $0x50] sm:$0xff] %vm201_vm0, %v4037_v39  ;;  %v5429_v44 = vpop.f32.mrb[44].mxu1 }
 0x2fa   : > { %v4040_v46 = vadd.f32 %v5871_v41, %v5429_v44  ;;  %v3928_v49 = vpop.f32.mrb[45].mxu1 }
 0x2fb   : > { %v4039_v43 = vadd.f32 %v5872_v63, %v3928_v49 }
 0x2fc   : > { %4072 = vst.msk [vmem:[%s7054_s4 + $0x68] sm:$0xff] %vm201_vm0, %v4040_v46 }
 0x2fd   : > { %4071 = vst.msk [vmem:[%s7054_s4 + $0x60] sm:$0xff] %vm201_vm0, %v4039_v43  ;;  %v5432_v2 = vpop.f32.mrb[46].mxu1 }
 0x2fe   : > { %v4042_v7 = vadd.f32 %v5873_v45, %v5432_v2  ;;  %v3938_v9 = vpop.f32.mrb[47].mxu1 }
 0x2ff   : > { %v4041_v47 = vadd.f32 %v5874_v15, %v3938_v9 }
 0x300   : > { %4074 = vst.msk [vmem:[%s7054_s4 + $0x78] sm:$0xff] %vm201_vm0, %v4042_v7 }
 0x301   : > { %4073 = vst.msk [vmem:[%s7054_s4 + $0x70] sm:$0xff] %vm201_vm0, %v4041_v47  ;;  %v5435_v18 = vpop.f32.mrb[48].mxu1 }
 0x302   : > { %v4044_v19 = vadd.f32 %v5875_v51, %v5435_v18  ;;  %v3948_v52 = vpop.f32.mrb[49].mxu1 }
 0x303   : > { %v4043_v1 = vadd.f32 %v5876_v53, %v3948_v52 }
 0x304   : > { %4076 = vst.msk [vmem:[%s7054_s4 + $0x88] sm:$0xff] %vm201_vm0, %v4044_v19 }
 0x305   : > { %4075 = vst.msk [vmem:[%s7054_s4 + $0x80] sm:$0xff] %vm201_vm0, %v4043_v1  ;;  %v5438_v55 = vpop.f32.mrb[50].mxu1 }
 0x306   : > { %v4046_v10 = vadd.f32 %v5877_v3, %v5438_v55  ;;  %v3958_v8 = vpop.f32.mrb[51].mxu1 }
 0x307   : > { %v4045_v0 = vadd.f32 %v5878_v11, %v3958_v8 }
 0x308   : > { %4078 = vst.msk [vmem:[%s7054_s4 + $0x98] sm:$0xff] %vm201_vm0, %v4046_v10 }
 0x309   : > { %4077 = vst.msk [vmem:[%s7054_s4 + $0x90] sm:$0xff] %vm201_vm0, %v4045_v0  ;;  %v5441_v24 = vpop.f32.mrb[52].mxu1 }
 0x30a   : > { %v4048_v61 = vadd.f32 %v5879_v50, %v5441_v24  ;;  %v3968_v25 = vpop.f32.mrb[53].mxu1 }
 0x30b   : > { %v4047_v54 = vadd.f32 %v5880_v59, %v3968_v25 }
 0x30c   : > { %4080 = vst.msk [vmem:[%s7054_s4 + $0xa8] sm:$0xff] %vm201_vm0, %v4048_v61 }
 0x30d   : > { %4079 = vst.msk [vmem:[%s7054_s4 + $0xa0] sm:$0xff] %vm201_vm0, %v4047_v54  ;;  %v5444_v6 = vpop.f32.mrb[54].mxu1 }
 0x30e   : > { %v4050_v57 = vadd.f32 %v5881_v5, %v5444_v6  ;;  %v3978_v48 = vpop.f32.mrb[55].mxu1 }
 0x30f   : > { %v4049_v56 = vadd.f32 %v5882_v13, %v3978_v48 }
 0x310   : > { %4082 = vst.msk [vmem:[%s7054_s4 + $0xb8] sm:$0xff] %vm201_vm0, %v4050_v57 }
 0x311   : > { %4081 = vst.msk [vmem:[%s7054_s4 + $0xb0] sm:$0xff] %vm201_vm0, %v4049_v56  ;;  %v5447_v12 = vpop.f32.mrb[56].mxu1 }
 0x312   : > { %v4052_v16 = vadd.f32 %v5883_v20, %v5447_v12  ;;  %v3988_v14 = vpop.f32.mrb[57].mxu1 }
 0x313   : > { %v4051_v26 = vadd.f32 %v5884_v22, %v3988_v14 }
 0x314   : > { %4084 = vst.msk [vmem:[%s7054_s4 + $0xc8] sm:$0xff] %vm201_vm0, %v4052_v16 }
 0x315   : > { %4083 = vst.msk [vmem:[%s7054_s4 + $0xc0] sm:$0xff] %vm201_vm0, %v4051_v26  ;;  %v5450_v21 = vpop.f32.mrb[58].mxu1 }
 0x316   : > { %v4054_v27 = vadd.f32 %v5885_v23, %v5450_v21  ;;  %v3998_v28 = vpop.f32.mrb[59].mxu1 }
 0x317   : > { %v4053_v30 = vadd.f32 %v5886_v29, %v3998_v28 }
 0x318   : > { %4086 = vst.msk [vmem:[%s7054_s4 + $0xd8] sm:$0xff] %vm201_vm0, %v4054_v27 }
 0x319   : > { %4085 = vst.msk [vmem:[%s7054_s4 + $0xd0] sm:$0xff] %vm201_vm0, %v4053_v30  ;;  %v5453_v31 = vpop.f32.mrb[60].mxu1 }
 0x31a   : > { %v4056_v34 = vadd.f32 %v5887_v32, %v5453_v31  ;;  %v4008_v17 = vpop.f32.mrb[61].mxu1 }
 0x31b   : > { %v4055_v33 = vadd.f32 %v5888_v36, %v4008_v17 }
 0x31c   : > { %4088 = vst.msk [vmem:[%s7054_s4 + $0xe8] sm:$0xff] %vm201_vm0, %v4056_v34 }
 0x31d   : > { %4087 = vst.msk [vmem:[%s7054_s4 + $0xe0] sm:$0xff] %vm201_vm0, %v4055_v33  ;;  %v5456_v4 = vpop.f32.mrb[62].mxu1 }
 0x31e   : > { %v4058_v62 = vadd.f32 %v5889_v38, %v5456_v4  ;;  %v4018_v35 = vpop.f32.mrb[63].mxu1 }
 0x31f   : > { %v4057_v37 = vadd.f32 %v5890_v40, %v4018_v35 }
 0x320   : > { %4090 = vst.msk [vmem:[%s7054_s4 + $0xf8] sm:$0xff] %vm201_vm0, %v4058_v62 }
 0x321   : > { %4089 = vst.msk [vmem:[%s7054_s4 + $0xf0] sm:$0xff] %vm201_vm0, %v4057_v37 }
 0x322   : > { %5904 = shalt.err (!%p5901_p3)
}
 0x323   : > { %s5905_s7 = scalar_lea.hbm %s7150_s10, 4096  ;;  %s5909_s26 = scalar_lea.hbm %s7205_s3, 8192 }
 0x324   : > { %p5906_p4 = scmp.ne.s32.totalorder %s7150_s10, %s5905_s7  ;;  %p5910_p9 = scmp.lt.u32.totalorder %s7150_s10, %s7205_s3 }
 0x325   : > { %p5911_p10 = scmp.lt.u32.totalorder %s5909_s26, %s5905_s7  ;;  %p5913_p12 = scmp.lt.u32.totalorder %s5905_s7, %s7150_s10 }
 0x326   : > { %p5907_p7 = pnand %p5906_p4, %p6017_p5 }
 0x327   : > { %p5912_p11 = por %p5911_p10, %p5910_p9 }
 0x328   : > { %p5908_p8 = pneg %p5907_p7 }
 0x329   : > { %p5914_p13 = por %p5913_p12, %p5912_p11 }
 0x32b   : > { %p5915_p0 = pnand %p5914_p13, %p5908_p8 }
 0x32d   : > { %5918 = shalt.err (!%p5915_p0)
}
 0x32e   : > { %s5957_s29 = smov 128   ;;  %s5958_s30 = smov 8  }
 0x32f   : > { %5817 = dma.vmem_to_hbm [thread:$0]  (%p6017_p5), %s7152_s6, 4096, %s7150_s10, %s7161_s16, %s5957_s29, %s5957_s29, %s5958_s30  }
 0x330 PF: > { %p5823_p1 = scmp.ge.s32.totalorder %s5953_s15, 2  ;;  %s4120_s4 = sand.u32 1, %s5941_s12  }
 0x331   : > { %s4121_s5 = scalar_lea.sflag [#allocation4], %s4120_s4 }
 0x332   : > { %p5820_p2 = pnand %p5823_p1, %p6021_p6 }
 0x334   : > { %5936 = dma.done.wait (!%p5820_p2), %s4121_s5, 4096  }
 0x335   : > { %5938 = vsyncadd (!%p5820_p2), %s4121_s5, 4294963200  ;;  %p13_p3 = scmp.ge.s32.totalorder %s6004_s18, 4   ;;  %s7288_s12 = smov %s5945_s13 }
 0x336   : > { %s7289_s13 = smov %s5949_s14  ;;  %s7290_s14 = smov %s6015_s21 }
 0x337   : > { %s7291_s15 = smov %s6004_s18  ;;  %15 = sbr.rel (!%p13_p3) target bundleno = 3 (0x3), region = 78 }
 0x33e   :  { %4126 = vsyncpa [#allocation4], 1 }
 0x33f   :  { %4128 = vsyncpa [#allocation4 + $0x1], 1 }

</bundles_post_ra>
